<compile_context>
chip_gen: v7x
topology: tpu7x:2x2x1
jax: 0.10.0
libtpu: 0.0.40
codegen_flags: <defaults>
</compile_context>

<pallas_src>
import jax
import jax.numpy as jnp
from jax.experimental import pallas as pl
from jax.experimental.pallas import tpu as pltpu

# ---------------- model configuration (small, consistent with __init__) --------------
OBS_DIM = 16          # obs_dim
ACTION_DIM = 4        # action_dim
HIST_DIM = 64         # stand-in history-encoder feature width
NUM_SAMPLES = 8       # number of belief samples drawn by history_encoder.sample
LATENT_DIM = 16       # config_critic.believer.latent_dim  (belief_encoder input = 16)
HIDDEN_SIZE = 64      # self.seq_model.hidden_size (belief_agg output width)
SHORTCUT = 64         # shortcut embedder hidden size (continuous-action branch)
QF_HIDDEN = 64        # config_critic.hidden_dims

LANES = 128           # TPU lane width
ROW_ALIGN = 16        # bf16 sublane packing: keep row tiles a multiple of 16
MAX_ROW_TILE = 512    # cap on rows per grid step (VMEM use stays ~a few MiB)

assert NUM_SAMPLES * LATENT_DIM == LANES
assert 2 * SHORTCUT == LANES

# x column layout: [hist(64) | obs(16) | act(4) | zero pad(44)]
X_OBS = HIST_DIM
X_ACT = X_OBS + OBS_DIM

# "wide" weight slab (128, 1280) column offsets (each matmul reads a lane slice)
CW_FIRST, CW_BE1, CW_AG1, CW_AG2, CW_Q2, CW_Q3 = 0, 256, 768, 896, 1024, 1152
W_WIDE_COLS = 1280
# "tall" weight slab (768, 128) row offsets
RW_BE2, RW_Q1 = 0, 512
W_TALL_ROWS = 768
# bias slab (1, 1536) column offsets
CB_FIRST, CB_BE1, CB_BE2, CB_AG1, CB_AG2, CB_Q1, CB_Q2, CB_Q3 = \
    0, 256, 768, 896, 1024, 1152, 1280, 1408
B_COLS = 1536


def _round_up(n, m):
    return ((n + m - 1) // m) * m


def _choose_row_tile(n):
    """Adaptive row tile: multiple of 16 sublanes, <= MAX_ROW_TILE, minimal padding."""
    n16 = _round_up(max(n, ROW_ALIGN), ROW_ALIGN)
    if n16 <= MAX_ROW_TILE:
        return n16
    n_tiles = -(-n16 // MAX_ROW_TILE)
    return _round_up(-(-n16 // n_tiles), ROW_ALIGN)


# ---------------- kernel: samples -> belief_encoder -> belief_agg -> shortcut -> qf ----
def _critic_kernel(x_ref, ww_ref, wt_ref, b_ref, out_ref):
    f32, bf16 = jnp.float32, jnp.bfloat16

    def bias(lo, width):
        return b_ref[:, lo:lo + width]                  # (1, width) f32, broadcasts

    x16 = x_ref[...]                                    # (R,128) bf16: [hist|obs|act|0]

    # fused first layer: 8 sample heads (lanes 0-127) + shortcut obs/act embedders
    # (lanes 128-255), one (128,256) MXU pass.  x dies here.
    first = jnp.maximum(
        jnp.dot(x16, ww_ref[:, CW_FIRST:CW_FIRST + 256], preferred_element_type=f32)
        + bias(CB_FIRST, 256), 0.0)
    s_all = first[:, :LANES].astype(bf16)               # (R,128) sample features
    eoea = first[:, LANES:].astype(bf16)                # (R,128) [relu(eo)|relu(ea)]

    # belief_encoder layer 1 over all 8 samples: block-diagonal (128,512) matmul.
    h = jnp.maximum(
        jnp.dot(s_all, ww_ref[:, CW_BE1:CW_BE1 + 512], preferred_element_type=f32)
        + bias(CB_BE1, 512), 0.0).astype(bf16)          # (R,512)

    # belief_encoder layer 2 + mean over samples: one (512,128) matmul with the 1/K
    # factor folded into the weights (exact in bf16, 1/8 is a power of two).
    belief = (jnp.dot(h, wt_ref[RW_BE2:RW_BE2 + 512, :], preferred_element_type=f32)
              + bias(CB_BE2, LANES))                    # (R,128), lanes 64+ are 0

    # belief_agg: Linear(64,64), ReLU, Linear(64, hidden_size)   (zero-padded to 128)
    ag1 = jnp.maximum(
        jnp.dot(belief.astype(bf16), ww_ref[:, CW_AG1:CW_AG1 + LANES],
                preferred_element_type=f32) + bias(CB_AG1, LANES), 0.0).astype(bf16)
    hidden = (jnp.dot(ag1, ww_ref[:, CW_AG2:CW_AG2 + LANES],
                      preferred_element_type=f32) + bias(CB_AG2, LANES)).astype(bf16)

    # twin Q MLPs: joint = [hidden|eo|ea] as a K=256 lane-concat; qf1 on lanes 0-63,
    # qf2 on lanes 64-127 of every layer output.
    joint = jnp.concatenate([hidden, eoea], axis=-1)    # (R,256) bf16
    h1 = jnp.maximum(
        jnp.dot(joint, wt_ref[RW_Q1:RW_Q1 + 256, :], preferred_element_type=f32)
        + bias(CB_Q1, LANES), 0.0).astype(bf16)
    h2 = jnp.maximum(
        jnp.dot(h1, ww_ref[:, CW_Q2:CW_Q2 + LANES], preferred_element_type=f32)
        + bias(CB_Q2, LANES), 0.0).astype(bf16)
    # lane-dense output slab: col 0 = q1, col 1 = q2, remaining lanes 0 (unmasked vst)
    out_ref[...] = (jnp.dot(h2, ww_ref[:, CW_Q3:CW_Q3 + LANES],
                            preferred_element_type=f32) + bias(CB_Q3, LANES))


# ---------------- host-side weight packing --------------------------------------------
def pack_params(p):
    """Pack the per-layer tensors into wide/tall bf16 weight slabs + one f32 bias row."""
    f32, bf16 = jnp.float32, jnp.bfloat16
    K = NUM_SAMPLES
    H, S = HIDDEN_SIZE, SHORTCUT

    # fused first layer: x(128) -> [8 sample heads (128) | eo|ea shortcut (128)]
    w_first = jnp.zeros((LANES, 2 * LANES), f32)
    ws_cat = jnp.concatenate([p["Ws"][k] for k in range(K)], axis=1)       # (64,128)
    w_first = (w_first.at[:HIST_DIM, :LANES].set(ws_cat)
                      .at[X_OBS:X_OBS + OBS_DIM, LANES:LANES + S].set(p["Wco"])
                      .at[X_ACT:X_ACT + ACTION_DIM, LANES + S:].set(p["Wca"]))
    b_first = (jnp.zeros((2 * LANES,), f32)
               .at[:LANES].set(p["bs"].reshape(K * LATENT_DIM))
               .at[LANES:LANES + S].set(p["bco"][0])
               .at[LANES + S:].set(p["bca"][0]))

    # belief_encoder layer 1: block-diagonal (128, 512) over the 8 samples
    w_be1 = jnp.zeros((LANES, K * 64), f32)
    for k in range(K):
        w_be1 = w_be1.at[k * LATENT_DIM:(k + 1) * LATENT_DIM,
                         k * 64:(k + 1) * 64].set(p["Wbe1"])
    b_be1 = jnp.tile(p["bbe1"][0], (K,))                                    # (512,)

    # belief_encoder layer 2 + mean over samples: (512,128), pre-scaled by 1/K
    w_be2 = jnp.zeros((K * 64, LANES), f32).at[:, :64].set(
        jnp.tile(p["Wbe2"], (K, 1)) / K)
    b_be2 = jnp.zeros((LANES,), f32).at[:64].set(p["bbe2"][0])

    # belief_agg
    w_ag1 = jnp.zeros((LANES, LANES), f32).at[:64, :64].set(p["Wag1"])
    b_ag1 = jnp.zeros((LANES,), f32).at[:64].set(p["bag1"][0])
    w_ag2 = jnp.zeros((LANES, LANES), f32).at[:64, :H].set(p["Wag2"])
    b_ag2 = jnp.zeros((LANES,), f32).at[:H].set(p["bag2"][0])

    # twin Q first layer: K=256 operand [hidden(128)|eo|ea(128)], both critics on lanes
    w_q1 = jnp.zeros((2 * LANES, LANES), f32)
    w_q1 = (w_q1.at[:H, :QF_HIDDEN].set(p["Wq1_1"][:H])
                .at[:H, QF_HIDDEN:].set(p["Wq2_1"][:H])
                .at[LANES:LANES + S, :QF_HIDDEN].set(p["Wq1_1"][H:H + S])
                .at[LANES:LANES + S, QF_HIDDEN:].set(p["Wq2_1"][H:H + S])
                .at[LANES + S:, :QF_HIDDEN].set(p["Wq1_1"][H + S:])
                .at[LANES + S:, QF_HIDDEN:].set(p["Wq2_1"][H + S:]))
    b_q1 = jnp.concatenate([p["bq1_1"][0], p["bq2_1"][0]])

    # twin Q second layer: block-diag(qf1, qf2)
    w_q2 = (jnp.zeros((LANES, LANES), f32)
            .at[:QF_HIDDEN, :QF_HIDDEN].set(p["Wq1_2"])
            .at[QF_HIDDEN:, QF_HIDDEN:].set(p["Wq2_2"]))
    b_q2 = jnp.concatenate([p["bq1_2"][0], p["bq2_2"][0]])

    # twin Q output layer into a lane-dense slab: col 0 = q1, col 1 = q2
    w_q3 = (jnp.zeros((LANES, LANES), f32)
            .at[:QF_HIDDEN, 0].set(p["Wq1_3"][:, 0])
            .at[QF_HIDDEN:, 1].set(p["Wq2_3"][:, 0]))
    b_q3 = (jnp.zeros((LANES,), f32)
            .at[0].set(p["bq1_3"][0, 0]).at[1].set(p["bq2_3"][0, 0]))

    w_wide = jnp.concatenate([w_first, w_be1, w_ag1, w_ag2, w_q2, w_q3],
                             axis=1).astype(bf16)                  # (128, 1280) bf16
    w_tall = jnp.concatenate([w_be2, w_q1], axis=0).astype(bf16)   # (768, 128)  bf16
    b_all = jnp.concatenate([b_first, b_be1, b_be2, b_ag1, b_ag2,
                             b_q1, b_q2, b_q3])[None, :]            # (1, 1536)   f32
    assert w_wide.shape == (LANES, W_WIDE_COLS)
    assert w_tall.shape == (W_TALL_ROWS, LANES)
    assert b_all.shape == (1, B_COLS)
    return w_wide, w_tall, b_all, p["W_h"].astype(bf16), p["b_h"]


# ---------------- forward wrapper ------------------------------------------------------
def critic_forward(packed, prev_actions, rewards, observs, current_actions):
    # mirrors Critic_RNN.forward asserts; prev_actions/rewards are unused downstream,
    # exactly like the PyTorch module (history encoder only consumes observs).
    assert prev_actions.ndim == rewards.ndim == observs.ndim == 3
    assert prev_actions.shape[0] == rewards.shape[0] == observs.shape[0]
    assert current_actions.shape[0] == observs.shape[0]
    w_wide, w_tall, b_all, wh, bh = packed
    f32, bf16 = jnp.float32, jnp.bfloat16

    T, B, _ = observs.shape
    N = T * B
    row_tile = _choose_row_tile(N)
    n_pad = _round_up(N, row_tile)
    grid = (n_pad // row_tile,)

    obs_f = observs.reshape(N, OBS_DIM)
    act_f = current_actions.reshape(N, ACTION_DIM)

    # stage 1 (XLA-fused, tiny & memory-bound): obs embedding + causal cumulative mean.
    # TODO(synk): stand-in for the GPT history encoder (BeliefVAEModelGPT) + sample().
    e = jax.nn.relu(jnp.dot(obs_f.astype(bf16), wh, preferred_element_type=f32) + bh)
    e = e.reshape(T, B, HIST_DIM)
    denom = jnp.arange(1, T + 1, dtype=f32)[:, None, None]
    hist = (jnp.cumsum(e, axis=0) / denom).reshape(N, HIST_DIM)

    # stage 2: pack row features into ONE bf16 128-lane slab [hist | obs | act | 0]
    pad_w = LANES - HIST_DIM - OBS_DIM - ACTION_DIM
    x = jnp.concatenate([hist.astype(bf16), obs_f.astype(bf16), act_f.astype(bf16),
                         jnp.zeros((N, pad_w), bf16)], axis=-1)
    x = jnp.pad(x, ((0, n_pad - N), (0, 0)))

    # stage 3 (Pallas): belief encode + aggregate + shortcut + twin Q heads
    q_slab = pl.pallas_call(
        _critic_kernel,
        out_shape=jax.ShapeDtypeStruct((n_pad, LANES), jnp.float32),
        grid=grid,
        in_specs=[pl.BlockSpec((row_tile, LANES), lambda i: (i, 0)),
                  pl.BlockSpec((LANES, W_WIDE_COLS), lambda i: (0, 0)),
                  pl.BlockSpec((W_TALL_ROWS, LANES), lambda i: (0, 0)),
                  pl.BlockSpec((1, B_COLS), lambda i: (0, 0))],
        out_specs=pl.BlockSpec((row_tile, LANES), lambda i: (i, 0)),
        compiler_params=pltpu.CompilerParams(dimension_semantics=("parallel",)),
    )(x, w_wide, w_tall, b_all)

    q1 = q_slab[:N, 0:1].reshape(T, B, 1)
    q2 = q_slab[:N, 1:2].reshape(T, B, 1)
    return q1, q2


# ---------------- pure-JAX reference (same bf16-matmul / f32-accumulate precision) -----
def reference_forward(params, observs, current_actions):
    f32, bf16 = jnp.float32, jnp.bfloat16

    def mm(a, w):  # mirrors the kernel's MXU precision policy
        return jnp.dot(a.astype(bf16), w.astype(bf16), preferred_element_type=f32)

    T, B, _ = observs.shape
    e = jax.nn.relu(mm(observs, params["W_h"]) + params["b_h"])
    hist = jnp.cumsum(e, axis=0) / jnp.arange(1, T + 1, dtype=f32)[:, None, None]

    s = jax.nn.relu(
        jnp.einsum("tbd,kde->tbke", hist.astype(bf16), params["Ws"].astype(bf16),
                   preferred_element_type=f32) + params["bs"])
    h = jax.nn.relu(mm(s, params["Wbe1"]) + params["bbe1"])
    h = mm(h, params["Wbe2"]) + params["bbe2"]
    belief = h.mean(axis=2)

    hidden = (mm(jax.nn.relu(mm(belief, params["Wag1"]) + params["bag1"]),
                 params["Wag2"]) + params["bag2"])
    eo = jax.nn.relu(mm(observs, params["Wco"]) + params["bco"])
    ea = jax.nn.relu(mm(current_actions, params["Wca"]) + params["bca"])
    joint = jnp.concatenate([hidden, eo, ea], axis=-1)

    def qf(x, w1, b1, w2, b2, w3, b3):
        hh = jax.nn.relu(mm(x, w1) + b1)
        hh = jax.nn.relu(mm(hh, w2) + b2)
        return mm(hh, w3) + b3

    q1 = qf(joint, params["Wq1_1"], params["bq1_1"], params["Wq1_2"], params["bq1_2"],
            params["Wq1_3"], params["bq1_3"])
    q2 = qf(joint, params["Wq2_1"], params["bq2_1"], params["Wq2_2"], params["bq2_2"],
            params["Wq2_3"], params["bq2_3"])
    return q1, q2


# ---------------- deterministic parameter init ----------------------------------------
def init_params(key):
    keys = list(jax.random.split(key, 32))
    it = iter(keys)

    def lin(fan_in, fan_out):
        kw, kb = jax.random.split(next(it))
        w = jax.random.normal(kw, (fan_in, fan_out), jnp.float32) / jnp.sqrt(float(fan_in))
        b = 0.01 * jax.random.normal(kb, (1, fan_out), jnp.float32)
        return w, b

    p = {}
    p["W_h"], p["b_h"] = lin(OBS_DIM, HIST_DIM)
    p["Ws"] = (jax.random.normal(next(it), (NUM_SAMPLES, HIST_DIM, LATENT_DIM),
                                 jnp.float32) / jnp.sqrt(float(HIST_DIM)))
    p["bs"] = 0.01 * jax.random.normal(next(it), (NUM_SAMPLES, LATENT_DIM), jnp.float32)
    p["Wbe1"], p["bbe1"] = lin(LATENT_DIM, 64)
    p["Wbe2"], p["bbe2"] = lin(64, 64)
    p["Wag1"], p["bag1"] = lin(64, 64)
    p["Wag2"], p["bag2"] = lin(64, HIDDEN_SIZE)
    p["Wco"], p["bco"] = lin(OBS_DIM, SHORTCUT)
    p["Wca"], p["bca"] = lin(ACTION_DIM, SHORTCUT)
    joint_dim = HIDDEN_SIZE + 2 * SHORTCUT
    for q in ("q1", "q2"):
        p[f"W{q}_1"], p[f"b{q}_1"] = lin(joint_dim, QF_HIDDEN)
        p[f"W{q}_2"], p[f"b{q}_2"] = lin(QF_HIDDEN, QF_HIDDEN)
        p[f"W{q}_3"], p[f"b{q}_3"] = lin(QF_HIDDEN, 1)
    return p


if __name__ == "__main__":
    T, B = 8, 8
    key = jax.random.PRNGKey(0)
    k_obs, k_pa, k_rw, k_ca, k_par = jax.random.split(key, 5)

    observs = jax.random.normal(k_obs, (T, B, OBS_DIM), jnp.float32)
    prev_actions = jax.random.normal(k_pa, (T, B, ACTION_DIM), jnp.float32)
    rewards = jax.random.normal(k_rw, (T, B, 1), jnp.float32)
    current_actions = jax.random.normal(k_ca, (T, B, ACTION_DIM), jnp.float32)

    params = init_params(k_par)
    packed = pack_params(params)

    fwd = jax.jit(critic_forward)
    q1, q2 = fwd(packed, prev_actions, rewards, observs, current_actions)
    jax.block_until_ready((q1, q2))

    r1, r2 = reference_forward(params, observs, current_actions)
    r1 = r1.block_until_ready()
    r2 = r2.block_until_ready()

    assert q1.shape == (T, B, 1) and q2.shape == (T, B, 1)
    assert bool(jnp.allclose(q1, r1, atol=2e-3, rtol=2e-3))
    assert bool(jnp.allclose(q2, r2, atol=2e-3, rtol=2e-3))

    print("KERNEL_OK")
</pallas_src>

<mosaic_0001>
module attributes {stable_mosaic.version = 11 : i64} {
  func.func @_critic_kernel(%arg0: i32, %arg1: memref<64x128xbf16, #tpu.memory_space<vmem>>, %arg2: memref<128x1280xbf16, #tpu.memory_space<vmem>>, %arg3: memref<768x128xbf16, #tpu.memory_space<vmem>>, %arg4: memref<1x1536xf32, #tpu.memory_space<vmem>>, %arg5: memref<64x128xf32, #tpu.memory_space<vmem>>) attributes {dimension_semantics = [#tpu.dimension_semantics<parallel>], iteration_bounds = array<i64: 1>, scalar_prefetch = 0 : i64, scratch_operands = 0 : i64, tpu.core_type = #tpu.core_type<tc>, window_params = [{transform_indices = @transform_0, window_bounds = array<i64: 64, 128>}, {pipeline_mode = #tpu.pipeline_mode<synchronous>, transform_indices = @transform_1, window_bounds = array<i64: 128, 1280>}, {pipeline_mode = #tpu.pipeline_mode<synchronous>, transform_indices = @transform_2, window_bounds = array<i64: 768, 128>}, {pipeline_mode = #tpu.pipeline_mode<synchronous>, transform_indices = @transform_3, window_bounds = array<i64: 1, 1536>}, {transform_indices = @transform_4, window_bounds = array<i64: 64, 128>}]} {
    %c0 = arith.constant 0 : index
    %c0_0 = arith.constant 0 : index
    %0 = vector.load %arg1[%c0, %c0_0] : memref<64x128xbf16, #tpu.memory_space<vmem>>, vector<64x128xbf16>
    %c0_1 = arith.constant 0 : index
    %c0_2 = arith.constant 0 : index
    %1 = vector.load %arg2[%c0_1, %c0_2] : memref<128x1280xbf16, #tpu.memory_space<vmem>>, vector<128x256xbf16>
    %cst = arith.constant dense<0.000000e+00> : vector<64x256xf32>
    %2 = tpu.matmul %0, %1, %cst {dimension_numbers = #tpu.dot_dimension_numbers<[1], [0], [0], [1], [0, 0, 1, 1], [], []>} : vector<64x128xbf16>, vector<128x256xbf16>, vector<64x256xf32> -> vector<64x256xf32>
    %c0_3 = arith.constant 0 : index
    %c0_4 = arith.constant 0 : index
    %3 = vector.load %arg4[%c0_3, %c0_4] : memref<1x1536xf32, #tpu.memory_space<vmem>>, vector<1x256xf32>
    %4 = vector.broadcast %3 : vector<1x256xf32> to vector<64x256xf32>
    %5 = arith.addf %2, %4 : vector<64x256xf32>
    %cst_5 = arith.constant 0.000000e+00 : f32
    %6 = vector.broadcast %cst_5 : f32 to vector<64x256xf32>
    %7 = arith.maximumf %5, %6 : vector<64x256xf32>
    %8 = vector.extract_strided_slice %7 {offsets = [0, 0], sizes = [64, 128], strides = [1, 1]} : vector<64x256xf32> to vector<64x128xf32>
    %9 = arith.truncf %8 : vector<64x128xf32> to vector<64x128xbf16>
    %10 = vector.extract_strided_slice %7 {offsets = [0, 128], sizes = [64, 128], strides = [1, 1]} : vector<64x256xf32> to vector<64x128xf32>
    %11 = arith.truncf %10 : vector<64x128xf32> to vector<64x128xbf16>
    %c0_6 = arith.constant 0 : index
    %c256 = arith.constant 256 : index
    %12 = vector.load %arg2[%c0_6, %c256] : memref<128x1280xbf16, #tpu.memory_space<vmem>>, vector<128x512xbf16>
    %cst_7 = arith.constant dense<0.000000e+00> : vector<64x512xf32>
    %13 = tpu.matmul %9, %12, %cst_7 {dimension_numbers = #tpu.dot_dimension_numbers<[1], [0], [0], [1], [0, 0, 1, 1], [], []>} : vector<64x128xbf16>, vector<128x512xbf16>, vector<64x512xf32> -> vector<64x512xf32>
    %c0_8 = arith.constant 0 : index
    %c256_9 = arith.constant 256 : index
    %14 = vector.load %arg4[%c0_8, %c256_9] : memref<1x1536xf32, #tpu.memory_space<vmem>>, vector<1x512xf32>
    %15 = vector.broadcast %14 : vector<1x512xf32> to vector<64x512xf32>
    %16 = arith.addf %13, %15 : vector<64x512xf32>
    %cst_10 = arith.constant 0.000000e+00 : f32
    %17 = vector.broadcast %cst_10 : f32 to vector<64x512xf32>
    %18 = arith.maximumf %16, %17 : vector<64x512xf32>
    %19 = arith.truncf %18 : vector<64x512xf32> to vector<64x512xbf16>
    %c0_11 = arith.constant 0 : index
    %c0_12 = arith.constant 0 : index
    %20 = vector.load %arg3[%c0_11, %c0_12] : memref<768x128xbf16, #tpu.memory_space<vmem>>, vector<512x128xbf16>
    %cst_13 = arith.constant dense<0.000000e+00> : vector<64x128xf32>
    %21 = tpu.matmul %19, %20, %cst_13 {dimension_numbers = #tpu.dot_dimension_numbers<[1], [0], [0], [1], [0, 0, 1, 1], [], []>} : vector<64x512xbf16>, vector<512x128xbf16>, vector<64x128xf32> -> vector<64x128xf32>
    %c0_14 = arith.constant 0 : index
    %c768 = arith.constant 768 : index
    %22 = vector.load %arg4[%c0_14, %c768] : memref<1x1536xf32, #tpu.memory_space<vmem>>, vector<1x128xf32>
    %23 = vector.broadcast %22 : vector<1x128xf32> to vector<64x128xf32>
    %24 = arith.addf %21, %23 : vector<64x128xf32>
    %25 = arith.truncf %24 : vector<64x128xf32> to vector<64x128xbf16>
    %c0_15 = arith.constant 0 : index
    %c768_16 = arith.constant 768 : index
    %26 = vector.load %arg2[%c0_15, %c768_16] : memref<128x1280xbf16, #tpu.memory_space<vmem>>, vector<128x128xbf16>
    %cst_17 = arith.constant dense<0.000000e+00> : vector<64x128xf32>
    %27 = tpu.matmul %25, %26, %cst_17 {dimension_numbers = #tpu.dot_dimension_numbers<[1], [0], [0], [1], [0, 0, 1, 1], [], []>} : vector<64x128xbf16>, vector<128x128xbf16>, vector<64x128xf32> -> vector<64x128xf32>
    %c0_18 = arith.constant 0 : index
    %c896 = arith.constant 896 : index
    %28 = vector.load %arg4[%c0_18, %c896] : memref<1x1536xf32, #tpu.memory_space<vmem>>, vector<1x128xf32>
    %29 = vector.broadcast %28 : vector<1x128xf32> to vector<64x128xf32>
    %30 = arith.addf %27, %29 : vector<64x128xf32>
    %cst_19 = arith.constant 0.000000e+00 : f32
    %31 = vector.broadcast %cst_19 : f32 to vector<64x128xf32>
    %32 = arith.maximumf %30, %31 : vector<64x128xf32>
    %33 = arith.truncf %32 : vector<64x128xf32> to vector<64x128xbf16>
    %c0_20 = arith.constant 0 : index
    %c896_21 = arith.constant 896 : index
    %34 = vector.load %arg2[%c0_20, %c896_21] : memref<128x1280xbf16, #tpu.memory_space<vmem>>, vector<128x128xbf16>
    %cst_22 = arith.constant dense<0.000000e+00> : vector<64x128xf32>
    %35 = tpu.matmul %33, %34, %cst_22 {dimension_numbers = #tpu.dot_dimension_numbers<[1], [0], [0], [1], [0, 0, 1, 1], [], []>} : vector<64x128xbf16>, vector<128x128xbf16>, vector<64x128xf32> -> vector<64x128xf32>
    %c0_23 = arith.constant 0 : index
    %c1024 = arith.constant 1024 : index
    %36 = vector.load %arg4[%c0_23, %c1024] : memref<1x1536xf32, #tpu.memory_space<vmem>>, vector<1x128xf32>
    %37 = vector.broadcast %36 : vector<1x128xf32> to vector<64x128xf32>
    %38 = arith.addf %35, %37 : vector<64x128xf32>
    %39 = arith.truncf %38 : vector<64x128xf32> to vector<64x128xbf16>
    %40 = tpu.concatenate %39, %11 in 1 : vector<64x128xbf16>, vector<64x128xbf16> -> vector<64x256xbf16>
    %c512 = arith.constant 512 : index
    %c0_24 = arith.constant 0 : index
    %41 = vector.load %arg3[%c512, %c0_24] : memref<768x128xbf16, #tpu.memory_space<vmem>>, vector<256x128xbf16>
    %cst_25 = arith.constant dense<0.000000e+00> : vector<64x128xf32>
    %42 = tpu.matmul %40, %41, %cst_25 {dimension_numbers = #tpu.dot_dimension_numbers<[1], [0], [0], [1], [0, 0, 1, 1], [], []>} : vector<64x256xbf16>, vector<256x128xbf16>, vector<64x128xf32> -> vector<64x128xf32>
    %c0_26 = arith.constant 0 : index
    %c1152 = arith.constant 1152 : index
    %43 = vector.load %arg4[%c0_26, %c1152] : memref<1x1536xf32, #tpu.memory_space<vmem>>, vector<1x128xf32>
    %44 = vector.broadcast %43 : vector<1x128xf32> to vector<64x128xf32>
    %45 = arith.addf %42, %44 : vector<64x128xf32>
    %cst_27 = arith.constant 0.000000e+00 : f32
    %46 = vector.broadcast %cst_27 : f32 to vector<64x128xf32>
    %47 = arith.maximumf %45, %46 : vector<64x128xf32>
    %48 = arith.truncf %47 : vector<64x128xf32> to vector<64x128xbf16>
    %c0_28 = arith.constant 0 : index
    %c1024_29 = arith.constant 1024 : index
    %49 = vector.load %arg2[%c0_28, %c1024_29] : memref<128x1280xbf16, #tpu.memory_space<vmem>>, vector<128x128xbf16>
    %cst_30 = arith.constant dense<0.000000e+00> : vector<64x128xf32>
    %50 = tpu.matmul %48, %49, %cst_30 {dimension_numbers = #tpu.dot_dimension_numbers<[1], [0], [0], [1], [0, 0, 1, 1], [], []>} : vector<64x128xbf16>, vector<128x128xbf16>, vector<64x128xf32> -> vector<64x128xf32>
    %c0_31 = arith.constant 0 : index
    %c1280 = arith.constant 1280 : index
    %51 = vector.load %arg4[%c0_31, %c1280] : memref<1x1536xf32, #tpu.memory_space<vmem>>, vector<1x128xf32>
    %52 = vector.broadcast %51 : vector<1x128xf32> to vector<64x128xf32>
    %53 = arith.addf %50, %52 : vector<64x128xf32>
    %cst_32 = arith.constant 0.000000e+00 : f32
    %54 = vector.broadcast %cst_32 : f32 to vector<64x128xf32>
    %55 = arith.maximumf %53, %54 : vector<64x128xf32>
    %56 = arith.truncf %55 : vector<64x128xf32> to vector<64x128xbf16>
    %c0_33 = arith.constant 0 : index
    %c1152_34 = arith.constant 1152 : index
    %57 = vector.load %arg2[%c0_33, %c1152_34] : memref<128x1280xbf16, #tpu.memory_space<vmem>>, vector<128x128xbf16>
    %cst_35 = arith.constant dense<0.000000e+00> : vector<64x128xf32>
    %58 = tpu.matmul %56, %57, %cst_35 {dimension_numbers = #tpu.dot_dimension_numbers<[1], [0], [0], [1], [0, 0, 1, 1], [], []>} : vector<64x128xbf16>, vector<128x128xbf16>, vector<64x128xf32> -> vector<64x128xf32>
    %c0_36 = arith.constant 0 : index
    %c1408 = arith.constant 1408 : index
    %59 = vector.load %arg4[%c0_36, %c1408] : memref<1x1536xf32, #tpu.memory_space<vmem>>, vector<1x128xf32>
    %60 = vector.broadcast %59 : vector<1x128xf32> to vector<64x128xf32>
    %61 = arith.addf %58, %60 : vector<64x128xf32>
    %c0_37 = arith.constant 0 : index
    %c0_38 = arith.constant 0 : index
    %62 = vector.load %arg5[%c0_37, %c0_38] : memref<64x128xf32, #tpu.memory_space<vmem>>, vector<64x128xf32>
    tpu.vector_store %arg5[%c0_37, %c0_38], %61 {strides = array<i32>} : memref<64x128xf32, #tpu.memory_space<vmem>>, vector<64x128xf32>,
    return
  }
  func.func @transform_0(%arg0: i32) -> (i32, i32) {
    %c0_i32 = arith.constant 0 : i32
    %c0_i32_0 = arith.constant 0 : i32
    return %arg0, %c0_i32 : i32, i32
  }
  func.func @transform_1(%arg0: i32) -> (i32, i32) {
    %c0_i32 = arith.constant 0 : i32
    %c0_i32_0 = arith.constant 0 : i32
    %c0_i32_1 = arith.constant 0 : i32
    return %c0_i32, %c0_i32_0 : i32, i32
  }
  func.func @transform_2(%arg0: i32) -> (i32, i32) {
    %c0_i32 = arith.constant 0 : i32
    %c0_i32_0 = arith.constant 0 : i32
    %c0_i32_1 = arith.constant 0 : i32
    return %c0_i32, %c0_i32_0 : i32, i32
  }
  func.func @transform_3(%arg0: i32) -> (i32, i32) {
    %c0_i32 = arith.constant 0 : i32
    %c0_i32_0 = arith.constant 0 : i32
    %c0_i32_1 = arith.constant 0 : i32
    return %c0_i32, %c0_i32_0 : i32, i32
  }
  func.func @transform_4(%arg0: i32) -> (i32, i32) {
    %c0_i32 = arith.constant 0 : i32
    %c0_i32_0 = arith.constant 0 : i32
    return %arg0, %c0_i32 : i32, i32
  }
}

</mosaic_0001>

<bundles_post_ra>
// kernel: critic_forward.1
= control target key start
LH: loop header
LB: loop body
LE: loop exit
PB: predicated region body
PF: predicated region fallthrough
CT: control target
= control target key end

     0   :  { %9 = vsyncpa [#allocation3], 0  ;;  %s2457_s15 = smov [#allocation2]   ;;  %s2810_s0 = inlined_call_operand.vmem [shape: bf16[64,128], index: 0, kind: input, shape index: {}]   ;;  %s2811_s1 = inlined_call_operand.hbm [shape: bf16[128,1280], index: 1, kind: input, shape index: {}]   ;;  %s2812_s2 = inlined_call_operand.vmem [shape: bf16[768,128], index: 2, kind: input, shape index: {}]   ;;  %s2813_s3 = inlined_call_operand.vmem [shape: f32[1,1536], index: 3, kind: input, shape index: {}]   ;;  %s2814_s4 = inlined_call_operand.vmem [shape: f32[64,128], index: 4, kind: output, shape index: {}]  }
   0x1   :  { %s17_s16 = sshll.u32 %s2457_s15, 4  ;;  %s2433_s19 = scalar_lea.hbm %s2811_s1, 10240  ;;  %s18_s16 = int_to_ptr.vmem [resolvable:$true] %s17_s16 }
   0x2   :  { %p2434_p0 = scmp.ne.s32.totalorder %s2811_s1, %s2433_s19  ;;  %p2437_p1 = scmp.lt.u32.totalorder %s2433_s19, %s2811_s1 }
   0x4   :  { %p2439_p2 = pnand %p2437_p1, %p2434_p0 }
   0x6   :  { %2442 = shalt.err (!%p2439_p2)
}
   0x7   :  { %s2443_s24 = scalar_lea.vmem %s18_s16, 10240  ;;  %p2448_p4 = scmp.lt.s32.totalorder %s18_s16, %s18_s16 }
   0x8   :  { %p2444_p3 = scmp.ne.s32.totalorder %s18_s16, %s2443_s24  ;;  %p2449_p5 = scmp.lt.s32.totalorder %s2443_s24, %s2443_s24 }
   0xa   :  { %p2450_p6 = por %p2449_p5, %p2448_p4 }
   0xc   :  { %p2451_p7 = pnand %p2450_p6, %p2444_p3 }
   0xe   :  { %2454 = shalt.err (!%p2451_p7)
}
   0xf   :  { %s2458_s25 = smov 640   ;;  %s2459_s26 = smov 40  }
  0x10   :  { %23 = dma.hbm_to_vmem [thread:$0]  %s2811_s1, 10240, %s18_s16, [#allocation3], %s2458_s25, %s2458_s25, %s2459_s26  }
  0x11   :  { %2455 = dma.done.wait [#allocation3], 10240  }
  0x12   :  { %2456 = vsyncadd [#allocation3], 4294957056  ;;  %v2460_v0 = vmov 0   ;;  %v2277_v1 = vld [vmem:[#allocation2 + $0x4] ss:$40 sps:$4 sm:$0xff]   ;;  %v2303_v40 = vld [vmem:[%s2810_s0 + $0x10] sm:$0xff]   ;;  %v58_v55 = vlaneseq }
  0x13   :  { %204 = vmatprep.mubr.bf16.mxu0 %v2460_v0  ;;  %515 = vmatprep.mubr.bf16.mxu1 %v2460_v0  ;;  %v2279_v2 = vld [vmem:[#allocation2] ss:$40 sps:$4 sm:$0xff]   ;;  %v2280_v3 = vld [vmem:[#allocation2 + $0x54] ss:$40 sps:$4 sm:$0xff]   ;;  %v2282_v4 = vld [vmem:[#allocation2 + $0x50] ss:$40 sps:$4 sm:$0xff]  }
  0x14   :  { %172 = vmatprep.subr.bf16.mxu0 %v2277_v1  ;;  %v2283_v5 = vld [vmem:[#allocation2 + $0xa4] ss:$40 sps:$4 sm:$0xff]   ;;  %v2285_v6 = vld [vmem:[#allocation2 + $0xa0] ss:$40 sps:$4 sm:$0xff]   ;;  %v2286_v7 = vld [vmem:[#allocation2 + $0xf4] ss:$40 sps:$4 sm:$0xff]  }
  0x15   :  { %173 = vmatpush1.bf16.msra.mxu0 %v2279_v2  ;;  %v2288_v8 = vld [vmem:[#allocation2 + $0xf0] ss:$40 sps:$4 sm:$0xff]   ;;  %v2289_v9 = vld [vmem:[#allocation2 + $0x144] ss:$40 sps:$4 sm:$0xff]   ;;  %v2291_v10 = vld [vmem:[#allocation2 + $0x140] ss:$40 sps:$4 sm:$0xff]  }
  0x16   :  { %174 = vmatprep.subr.bf16.mxu0 %v2280_v3  ;;  %v2305_v11 = vld [vmem:[#allocation2 + $0xc] ss:$40 sps:$4 sm:$0xff]   ;;  %v2310_v13 = vld [vmem:[#allocation2 + $0x8] ss:$40 sps:$4 sm:$0xff]   ;;  %v2311_v14 = vld [vmem:[#allocation2 + $0x5c] ss:$40 sps:$4 sm:$0xff]  }
  0x17   :  { %v2292_v12 = vld [vmem:[#allocation2 + $0x194] ss:$40 sps:$4 sm:$0xff]   ;;  %483 = vmatprep.subr.bf16.mxu1 %v2305_v11  ;;  %v2294_v15 = vld [vmem:[#allocation2 + $0x190] ss:$40 sps:$4 sm:$0xff]   ;;  %v2295_v16 = vld [vmem:[#allocation2 + $0x1e4] ss:$40 sps:$4 sm:$0xff]  }
  0x18   :  { %484 = vmatpush1.bf16.msra.mxu1 %v2310_v13  ;;  %v2316_v17 = vld [vmem:[#allocation2 + $0x58] ss:$40 sps:$4 sm:$0xff]   ;;  %v2317_v18 = vld [vmem:[#allocation2 + $0xac] ss:$40 sps:$4 sm:$0xff]   ;;  %v2322_v20 = vld [vmem:[#allocation2 + $0xa8] ss:$40 sps:$4 sm:$0xff]  }
  0x19   :  { %175 = vmatpush1.bf16.msra.mxu0 %v2282_v4  ;;  %485 = vmatprep.subr.bf16.mxu1 %v2311_v14  ;;  %v2297_v19 = vld [vmem:[#allocation2 + $0x1e0] ss:$40 sps:$4 sm:$0xff]   ;;  %v2298_v21 = vld [vmem:[#allocation2 + $0x234] ss:$40 sps:$4 sm:$0xff]   ;;  %v2300_v23 = vld [vmem:[#allocation2 + $0x230] ss:$40 sps:$4 sm:$0xff]  }
  0x1a   :  { %176 = vmatprep.subr.bf16.mxu0 %v2283_v5  ;;  %v2323_v22 = vld [vmem:[#allocation2 + $0xfc] ss:$40 sps:$4 sm:$0xff]   ;;  %v2328_v25 = vld [vmem:[#allocation2 + $0xf8] ss:$40 sps:$4 sm:$0xff]   ;;  %v2329_v26 = vld [vmem:[#allocation2 + $0x14c] ss:$40 sps:$4 sm:$0xff]  }
  0x1b   :  { %v2309_v24 = vld [vmem:[#allocation2 + $0x14] ss:$40 sps:$4 sm:$0xff]   ;;  %v2301_v27 = vld [vmem:[%s2810_s0] sm:$0xff]   ;;  %v2307_v28 = vld [vmem:[#allocation2 + $0x10] ss:$40 sps:$4 sm:$0xff]   ;;  %v2522_v56 = vshrl.u32 %v58_v55, 7 }
  0x1c   :  { %486 = vmatpush1.bf16.msra.mxu1 %v2316_v17  ;;  %v2315_v29 = vld [vmem:[#allocation2 + $0x64] ss:$40 sps:$4 sm:$0xff]   ;;  %v2334_v30 = vld [vmem:[#allocation2 + $0x148] ss:$40 sps:$4 sm:$0xff]   ;;  %v2321_v33 = vld [vmem:[#allocation2 + $0xb4] ss:$40 sps:$4 sm:$0xff]  }
  0x1d   :  { %177 = vmatpush1.bf16.msra.mxu0 %v2285_v6  ;;  %487 = vmatprep.subr.bf16.mxu1 %v2317_v18  ;;  %v2335_v31 = vld [vmem:[#allocation2 + $0x19c] ss:$40 sps:$4 sm:$0xff]   ;;  %v2313_v32 = vld [vmem:[#allocation2 + $0x60] ss:$40 sps:$4 sm:$0xff]   ;;  %v2319_v36 = vld [vmem:[#allocation2 + $0xb0] ss:$40 sps:$4 sm:$0xff]  }
  0x1e   :  { %178 = vmatprep.subr.bf16.mxu0 %v2286_v7  ;;  %v2340_v34 = vld [vmem:[#allocation2 + $0x198] ss:$40 sps:$4 sm:$0xff]   ;;  %v2302_v35 = vld [vmem:[%s2810_s0 + $0x8] sm:$0xff]   ;;  %v2333_v39 = vld [vmem:[#allocation2 + $0x154] ss:$40 sps:$4 sm:$0xff]   ;;  %v60_v57 = vsub.s32 0, %v2522_v56 }
  0x1f   :  { %v2327_v37 = vld [vmem:[#allocation2 + $0x104] ss:$40 sps:$4 sm:$0xff]   ;;  %v2325_v38 = vld [vmem:[#allocation2 + $0x100] ss:$40 sps:$4 sm:$0xff]   ;;  %v2331_v41 = vld [vmem:[#allocation2 + $0x150] ss:$40 sps:$4 sm:$0xff]  }
  0x20   :  { %488 = vmatpush1.bf16.msra.mxu1 %v2322_v20  ;;  %v2339_v42 = vld [vmem:[#allocation2 + $0x1a4] ss:$40 sps:$4 sm:$0xff]   ;;  %v2337_v43 = vld [vmem:[#allocation2 + $0x1a0] ss:$40 sps:$4 sm:$0xff]   ;;  %v2304_v44 = vld [vmem:[%s2810_s0 + $0x18] sm:$0xff]   ;;  %v64_v59 = vsub.s32 1, %v2522_v56 }
  0x21   :  { %179 = vmatpush1.bf16.msra.mxu0 %v2288_v8  ;;  %489 = vmatprep.subr.bf16.mxu1 %v2323_v22  ;;  %v2341_v45 = vld [vmem:[#allocation2 + $0x1ec] ss:$40 sps:$4 sm:$0xff]   ;;  %v2343_v47 = vld [vmem:[#allocation2 + $0x1f0] ss:$40 sps:$4 sm:$0xff]   ;;  %v2347_v49 = vld [vmem:[#allocation2 + $0x23c] ss:$40 sps:$4 sm:$0xff]  }
  0x22   :  { %180 = vmatprep.subr.bf16.mxu0 %v2289_v9  ;;  %v2345_v46 = vld [vmem:[#allocation2 + $0x1f4] ss:$40 sps:$4 sm:$0xff]   ;;  %v2346_v48 = vld [vmem:[#allocation2 + $0x1e8] ss:$40 sps:$4 sm:$0xff]   ;;  %v2351_v50 = vld [vmem:[#allocation2 + $0x244] ss:$40 sps:$4 sm:$0xff]  }
  0x23   :  { %v2349_v51 = vld [vmem:[#allocation2 + $0x240] ss:$40 sps:$4 sm:$0xff]  }
  0x24   :  { %490 = vmatpush1.bf16.msra.mxu1 %v2328_v25  ;;  %v2352_v52 = vld [vmem:[#allocation2 + $0x238] ss:$40 sps:$4 sm:$0xff]   ;;  %v2359_v17 = vld [vmem:[%s2812_s2 + $0xc8] sm:$0xff]  }
  0x25   :  { %181 = vmatpush1.bf16.msra.mxu0 %v2291_v10  ;;  %491 = vmatprep.subr.bf16.mxu1 %v2329_v26  ;;  %v2353_v53 = vld [vmem:[%s2812_s2 + $0x40] sm:$0xff]   ;;  %v2360_v25 = vld [vmem:[%s2812_s2 + $0x88] sm:$0xff]  }
  0x26   :  { %182 = vmatprep.subr.bf16.mxu0 %v2292_v12  ;;  %v2355_v54 = vld [vmem:[%s2812_s2 + $0xc0] sm:$0xff]  }
  0x27   :  { %v56_v58 = vld [vmem:[%s2813_s3] sm:$0x3] }
  0x28   :  { %492 = vmatpush1.bf16.msra.mxu1 %v2334_v30  ;;  %v2531_v60 = vrot.slane %v56_v58, %v60_v57  ;;  %v2535_v61 = vrot.slane %v56_v58, %v64_v59  ;;  %v2354_v12 = vld [vmem:[%s2812_s2] sm:$0xff]  }
  0x29   :  { %183 = vmatpush1.bf16.msra.mxu0 %v2294_v15  ;;  %493 = vmatprep.subr.bf16.mxu1 %v2335_v31  ;;  %v2356_v13 = vld [vmem:[%s2812_s2 + $0x80] sm:$0xff]  }
  0x2a   :  { %184 = vmatprep.subr.bf16.mxu0 %v2295_v16  ;;  %v2357_v16 = vld [vmem:[%s2812_s2 + $0x48] sm:$0xff]   ;;  %v2370_v58 = vld [vmem:[%s2812_s2 + $0x20] sm:$0xff]  }
  0x2c   :  { %494 = vmatpush1.bf16.msra.mxu1 %v2340_v34  ;;  %v2362_v34 = vld [vmem:[%s2812_s2 + $0x10] sm:$0xff]  }
  0x2d   :  { %185 = vmatpush1.bf16.msra.mxu0 %v2297_v19  ;;  %495 = vmatprep.subr.bf16.mxu1 %v2341_v45 }
  0x2e   :  { %186 = vmatprep.subr.bf16.mxu0 %v2298_v21 }
  0x30   :  { %496 = vmatpush1.bf16.msra.mxu1 %v2346_v48 }
  0x31   :  { %187 = vmatpush1.bf16.msra.mxu0 %v2300_v23  ;;  %497 = vmatprep.subr.bf16.mxu1 %v2347_v49  ;;  %v2369_v49 = vld [vmem:[%s2812_s2 + $0x60] sm:$0xff]  }
  0x32   :  { %556 = vmatprep.subr.bf16.mxu0 %v2309_v24  ;;  %v2358_v24 = vld [vmem:[%s2812_s2 + $0x8] sm:$0xff]  }
  0x34   :  { %205 = vmatmul.mubr.bf16.vlgmr.msra.gmra.mrb[0].mxu0 %v2301_v27  ;;  %498 = vmatpush1.bf16.msra.mxu1 %v2352_v52  ;;  %v2361_v27 = vld [vmem:[%s2812_s2 + $0x50] sm:$0xff]  }
  0x35   :  { %214 = vmatprep.mubr.bf16.mxu0 %v2460_v0  ;;  %557 = vmatpush1.bf16.msra.mxu0 %v2307_v28  ;;  %v2363_v28 = vld [vmem:[%s2812_s2 + $0xd0] sm:$0xff]  }
  0x36   :  { %558 = vmatprep.subr.bf16.mxu0 %v2315_v29  ;;  %2009 = vmatprep.subr.bf16.mxu1 %v2353_v53 }
  0x39   :  { %559 = vmatpush1.bf16.msra.mxu0 %v2313_v32 }
  0x3a   :  { %560 = vmatprep.subr.bf16.mxu0 %v2321_v33 }
  0x3c   :  { %215 = vmatmul.mubr.bf16.gmra.mrb[4].mxu0 %v2302_v35  ;;  %v2364_v35 = vld [vmem:[%s2812_s2 + $0x90] sm:$0xff]  }
  0x3d   :  { %224 = vmatprep.mubr.bf16.mxu0 %v2460_v0  ;;  %561 = vmatpush1.bf16.msra.mxu0 %v2319_v36 }
  0x3e   :  { %562 = vmatprep.subr.bf16.mxu0 %v2327_v37 }
  0x41   :  { %563 = vmatpush1.bf16.msra.mxu0 %v2325_v38  ;;  %v2365_v38 = vld [vmem:[%s2812_s2 + $0x58] sm:$0xff]  }
  0x42   :  { %564 = vmatprep.subr.bf16.mxu0 %v2333_v39  ;;  %v2367_v39 = vld [vmem:[%s2812_s2 + $0xd8] sm:$0xff]  }
  0x44   :  { %225 = vmatmul.mubr.bf16.gmra.mrb[8].mxu0 %v2303_v40 }
  0x45   :  { %234 = vmatprep.mubr.bf16.mxu0 %v2460_v0  ;;  %565 = vmatpush1.bf16.msra.mxu0 %v2331_v41 }
  0x46   :  { %566 = vmatprep.subr.bf16.mxu0 %v2339_v42 }
  0x49   :  { %567 = vmatpush1.bf16.msra.mxu0 %v2337_v43 }
  0x4a   :  { %568 = vmatprep.subr.bf16.mxu0 %v2345_v46  ;;  %v2366_v46 = vld [vmem:[%s2812_s2 + $0x18] sm:$0xff]  }
  0x4c   :  { %235 = vmatmul.mubr.bf16.gmra.mrb[12].mxu0 %v2304_v44 }
  0x4d   :  { %588 = vmatprep.mubr.bf16.mxu0 %v2460_v0  ;;  %569 = vmatpush1.bf16.msra.mxu0 %v2343_v47  ;;  %v2368_v47 = vld [vmem:[%s2812_s2 + $0x98] sm:$0xff]  }
  0x4e   :  { %570 = vmatprep.subr.bf16.mxu0 %v2351_v50  ;;  %v2371_v50 = vld [vmem:[%s2812_s2 + $0xe0] sm:$0xff]  }
  0x51   :  { %571 = vmatpush1.bf16.msra.mxu0 %v2349_v51 }
  0x52   :  { %2049 = vmatprep.subr.bf16.mxu0 %v2355_v54 }
 0x107   :  { %v206_v62 = vpop.f32.mrb[0].mxu0 }
 0x108   :  { %v207_v63 = vadd.f32 %v206_v62, %v2531_v60  ;;  %v208_v1 = vpop.f32.mrb[1].mxu0  ;;  %v2372_v62 = vld [vmem:[%s2812_s2 + $0xa0] sm:$0xff]  }
 0x109   :  { %v209_v2 = vadd.f32 %v208_v1, %v2535_v61  ;;  %v210_v3 = vpop.f32.mrb[2].mxu0 }
 0x10a   :  { %v211_v4 = vadd.f32 %v210_v3, %v2531_v60  ;;  %v212_v5 = vpop.f32.mrb[3].mxu0  ;;  %v245_v7 = vmax.f32 %v207_v63, 0.0  ;;  %v2375_v3 = vld [vmem:[%s2812_s2 + $0xe8] sm:$0xff]  }
 0x10b   :  { %v213_v6 = vadd.f32 %v212_v5, %v2535_v61  ;;  %v246_v9 = vmax.f32 %v209_v2, 0.0  ;;  %v2373_v2 = vld [vmem:[%s2812_s2 + $0x68] sm:$0xff]  }
 0x10c   :  { %v247_v8 = vmax.f32 %v211_v4, 0.0 }
 0x10d   :  { %v248_v10 = vmax.f32 %v213_v6, 0.0 }
 0x10e   :  { %v261_v11 = vpack.c.bf16 %v247_v8, %v245_v7 }
 0x10f   :  { %v2547_v14 = vpack.c.bf16 %v248_v10, %v246_v9  ;;  %v216_v15 = vpop.f32.mrb[4].mxu0  ;;  %v2374_v10 = vld [vmem:[%s2812_s2 + $0x28] sm:$0xff]  }
 0x110   :  { %v217_v18 = vadd.f32 %v216_v15, %v2531_v60  ;;  %v218_v19 = vpop.f32.mrb[5].mxu0  ;;  %516 = vmatmul.mubr.bf16.vlgmr.msra.gmra.mrb[0].mxu1 %v261_v11  ;;  %589 = vmatmul.mubr.bf16.vlgmr.msra.gmra.mrb[16].mxu0 %v261_v11 }
 0x111   :  { %v219_v20 = vadd.f32 %v218_v19, %v2535_v61  ;;  %v220_v21 = vpop.f32.mrb[6].mxu0  ;;  %525 = vmatprep.mubr.bf16.mxu1 %v2460_v0  ;;  %598 = vmatprep.mubr.bf16.mxu0 %v2460_v0  ;;  %v2378_v19 = vld [vmem:[%s2812_s2 + $0x30] sm:$0xff]  }
 0x112   :  { %v221_v22 = vadd.f32 %v220_v21, %v2531_v60  ;;  %v222_v23 = vpop.f32.mrb[7].mxu0  ;;  %2010 = vmatpush3.bf16.msra.mxu1 %v2354_v12  ;;  %2050 = vmatpush3.bf16.msra.mxu0 %v2356_v13  ;;  %v249_v29 = vmax.f32 %v217_v18, 0.0  ;;  %v2379_v18 = vld [vmem:[%s2812_s2 + $0xf0] sm:$0xff]   ;;  %v2381_v21 = vld [vmem:[%s2812_s2 + $0x78] sm:$0xff]  }
 0x113   :  { %v223_v26 = vadd.f32 %v222_v23, %v2535_v61  ;;  %2011 = vmatprep.subr.bf16.mxu1 %v2357_v16  ;;  %2051 = vmatprep.subr.bf16.mxu0 %v2359_v17  ;;  %v250_v31 = vmax.f32 %v219_v20, 0.0  ;;  %v2380_v20 = vld [vmem:[%s2812_s2 + $0xb0] sm:$0xff]   ;;  %v2382_v23 = vld [vmem:[%s2812_s2 + $0x38] sm:$0xff]  }
 0x114   :  { %v251_v30 = vmax.f32 %v221_v22, 0.0  ;;  %v2383_v22 = vld [vmem:[%s2812_s2 + $0xf8] sm:$0xff]  }
 0x115   :  { %v252_v32 = vmax.f32 %v223_v26, 0.0  ;;  %v313_v26 = vsub.s32 2, %v2522_v56 }
 0x116   :  { %v262_v33 = vpack.c.bf16 %v251_v30, %v249_v29  ;;  %2012 = vmatpush3.bf16.msra.mxu1 %v2358_v24  ;;  %2052 = vmatpush3.bf16.msra.mxu0 %v2360_v25  ;;  %v2384_v24 = vld [vmem:[%s2812_s2 + $0xb8] sm:$0xff]  }
 0x117   :  { %v2579_v36 = vpack.c.bf16 %v252_v32, %v250_v31  ;;  %v226_v37 = vpop.f32.mrb[8].mxu0  ;;  %2013 = vmatprep.subr.bf16.mxu1 %v2361_v27  ;;  %2053 = vmatprep.subr.bf16.mxu0 %v2363_v28  ;;  %v2385_v25 = vld [vmem:[#allocation2 + $0x18] ss:$40 sps:$4 sm:$0xff]   ;;  %v317_v28 = vsub.s32 3, %v2522_v56 }
 0x118   :  { %v227_v40 = vadd.f32 %v226_v37, %v2531_v60  ;;  %v228_v41 = vpop.f32.mrb[9].mxu0  ;;  %526 = vmatmul.mubr.bf16.gmra.mrb[4].mxu1 %v262_v33  ;;  %599 = vmatmul.mubr.bf16.gmra.mrb[20].mxu0 %v262_v33  ;;  %v301_v27 = vld [vmem:[%s2813_s3 + $0x2] sm:$0xf] }
 0x119   :  { %v229_v42 = vadd.f32 %v228_v41, %v2535_v61  ;;  %v230_v43 = vpop.f32.mrb[10].mxu0  ;;  %535 = vmatprep.mubr.bf16.mxu1 %v2460_v0  ;;  %608 = vmatprep.mubr.bf16.mxu0 %v2460_v0  ;;  %v2664_v29 = vrot.slane %v301_v27, %v60_v57  ;;  %v2666_v30 = vrot.slane %v301_v27, %v313_v26 }
 0x11a   :  { %v231_v44 = vadd.f32 %v230_v43, %v2531_v60  ;;  %v232_v45 = vpop.f32.mrb[11].mxu0  ;;  %2014 = vmatpush3.bf16.msra.mxu1 %v2362_v34  ;;  %2054 = vmatpush3.bf16.msra.mxu0 %v2364_v35  ;;  %v253_v51 = vmax.f32 %v227_v40, 0.0  ;;  %v2670_v31 = vrot.slane %v301_v27, %v64_v59  ;;  %v2672_v32 = vrot.slane %v301_v27, %v317_v28 }
 0x11b   :  { %v233_v48 = vadd.f32 %v232_v45, %v2535_v61  ;;  %2015 = vmatprep.subr.bf16.mxu1 %v2365_v38  ;;  %2055 = vmatprep.subr.bf16.mxu0 %v2367_v39  ;;  %v254_v53 = vmax.f32 %v229_v42, 0.0 }
 0x11c   :  { %v255_v52 = vmax.f32 %v231_v44, 0.0 }
 0x11d   :  { %v256_v54 = vmax.f32 %v233_v48, 0.0 }
 0x11e   :  { %v263_v55 = vpack.c.bf16 %v255_v52, %v253_v51  ;;  %2016 = vmatpush3.bf16.msra.mxu1 %v2366_v46  ;;  %2056 = vmatpush3.bf16.msra.mxu0 %v2368_v47 }
 0x11f   :  { %v2611_v63 = vpack.c.bf16 %v256_v54, %v254_v53  ;;  %v236_v1 = vpop.f32.mrb[12].mxu0  ;;  %2017 = vmatprep.subr.bf16.mxu1 %v2369_v49  ;;  %2057 = vmatprep.subr.bf16.mxu0 %v2371_v50 }
 0x120   :  { %v237_v4 = vadd.f32 %v236_v1, %v2531_v60  ;;  %v238_v5 = vpop.f32.mrb[13].mxu0  ;;  %536 = vmatmul.mubr.bf16.gmra.mrb[8].mxu1 %v263_v55  ;;  %609 = vmatmul.mubr.bf16.gmra.mrb[24].mxu0 %v263_v55 }
 0x121   :  { %v239_v6 = vadd.f32 %v238_v5, %v2535_v61  ;;  %v240_v7 = vpop.f32.mrb[14].mxu0  ;;  %545 = vmatprep.mubr.bf16.mxu1 %v2460_v0  ;;  %618 = vmatprep.mubr.bf16.mxu0 %v2460_v0 }
 0x122   :  { %v241_v8 = vadd.f32 %v240_v7, %v2531_v60  ;;  %v242_v9 = vpop.f32.mrb[15].mxu0  ;;  %2018 = vmatpush3.bf16.msra.mxu1 %v2370_v58  ;;  %2058 = vmatpush3.bf16.msra.mxu0 %v2372_v62  ;;  %v257_v12 = vmax.f32 %v237_v4, 0.0  ;;  %v2376_v60 = vld [vmem:[%s2812_s2 + $0xa8] sm:$0xff]  }
 0x123   :  { %v243_v11 = vadd.f32 %v242_v9, %v2535_v61  ;;  %2019 = vmatprep.subr.bf16.mxu1 %v2373_v2  ;;  %2059 = vmatprep.subr.bf16.mxu0 %v2375_v3  ;;  %v258_v15 = vmax.f32 %v239_v6, 0.0  ;;  %v2377_v61 = vld [vmem:[%s2812_s2 + $0x70] sm:$0xff]  }
 0x124   :  { %v259_v13 = vmax.f32 %v241_v8, 0.0  ;;  %v2386_v8 = vld [vmem:[#allocation2 + $0x68] ss:$40 sps:$4 sm:$0xff]  }
 0x125   :  { %v260_v16 = vmax.f32 %v243_v11, 0.0 }
 0x126   :  { %v264_v17 = vpack.c.bf16 %v259_v13, %v257_v12  ;;  %2020 = vmatpush3.bf16.msra.mxu1 %v2374_v10  ;;  %2060 = vmatpush3.bf16.msra.mxu0 %v2376_v60 }
 0x127   :  { %v2628_v0 = vpack.c.bf16 %v260_v16, %v258_v15  ;;  %2021 = vmatprep.subr.bf16.mxu1 %v2377_v61  ;;  %2061 = vmatprep.subr.bf16.mxu0 %v2379_v18 }
 0x128   :  { %546 = vmatmul.mubr.bf16.gmra.mrb[12].mxu1 %v264_v17  ;;  %619 = vmatmul.mubr.bf16.gmra.mrb[28].mxu0 %v264_v17 }
 0x12a   :  { %2022 = vmatpush3.bf16.msra.mxu1 %v2378_v19  ;;  %2062 = vmatpush3.bf16.msra.mxu0 %v2380_v20 }
 0x12b   :  { %2023 = vmatprep.subr.bf16.mxu1 %v2381_v21  ;;  %2063 = vmatprep.subr.bf16.mxu0 %v2383_v22  ;;  %v2387_v22 = vld [vmem:[#allocation2 + $0xb8] ss:$40 sps:$4 sm:$0xff]  }
 0x12e   :  { %2024 = vmatpush3.bf16.msra.mxu1 %v2382_v23  ;;  %2064 = vmatpush3.bf16.msra.mxu0 %v2384_v24 }
 0x12f   :  { %2177 = vmatprep.subr.bf16.mxu1 %v2385_v25 }
 0x1e3   :  { %v517_v33 = vpop.f32.mrb[0].mxu1  ;;  %v590_v34 = vpop.f32.mrb[16].mxu0 }
 0x1e4   :  { %v518_v35 = vadd.f32 %v517_v33, %v2664_v29  ;;  %v591_v37 = vadd.f32 %v590_v34, %v2666_v30  ;;  %v519_v38 = vpop.f32.mrb[1].mxu1  ;;  %v592_v39 = vpop.f32.mrb[17].mxu0 }
 0x1e5   :  { %v520_v40 = vadd.f32 %v519_v38, %v2670_v31  ;;  %v593_v57 = vadd.f32 %v592_v39, %v2672_v32  ;;  %v521_v41 = vpop.f32.mrb[2].mxu1  ;;  %v594_v42 = vpop.f32.mrb[18].mxu0 }
 0x1e6   :  { %v522_v56 = vadd.f32 %v521_v41, %v2664_v29  ;;  %v595_v59 = vadd.f32 %v594_v42, %v2666_v30  ;;  %v523_v43 = vpop.f32.mrb[3].mxu1  ;;  %v596_v44 = vpop.f32.mrb[19].mxu0  ;;  %v629_v47 = vmax.f32 %v518_v35, 0.0  ;;  %v631_v48 = vmax.f32 %v591_v37, 0.0  ;;  %v2388_v41 = vld [vmem:[#allocation2 + $0x108] ss:$40 sps:$4 sm:$0xff]  }
 0x1e7   :  { %v524_v45 = vadd.f32 %v523_v43, %v2670_v31  ;;  %v597_v46 = vadd.f32 %v596_v44, %v2672_v32  ;;  %v630_v51 = vmax.f32 %v520_v40, 0.0  ;;  %v632_v52 = vmax.f32 %v593_v57, 0.0 }
 0x1e8   :  { %v633_v49 = vmax.f32 %v522_v56, 0.0  ;;  %v635_v50 = vmax.f32 %v595_v59, 0.0 }
 0x1e9   :  { %v634_v53 = vmax.f32 %v524_v45, 0.0  ;;  %v636_v54 = vmax.f32 %v597_v46, 0.0 }
 0x1ea   :  { %v661_v55 = vpack.c.bf16 %v633_v49, %v629_v47  ;;  %v663_v58 = vpack.c.bf16 %v635_v50, %v631_v48 }
 0x1eb   :  { %v662_v62 = vpack.c.bf16 %v634_v53, %v630_v51  ;;  %v664_v1 = vpack.c.bf16 %v636_v54, %v632_v52  ;;  %v527_v2 = vpop.f32.mrb[4].mxu1  ;;  %v600_v3 = vpop.f32.mrb[20].mxu0 }
 0x1ec   :  { %v528_v4 = vadd.f32 %v527_v2, %v2664_v29  ;;  %v601_v5 = vadd.f32 %v600_v3, %v2666_v30  ;;  %v529_v6 = vpop.f32.mrb[5].mxu1  ;;  %v602_v7 = vpop.f32.mrb[21].mxu0 }
 0x1ed   :  { %v530_v9 = vadd.f32 %v529_v6, %v2670_v31  ;;  %v603_v10 = vadd.f32 %v602_v7, %v2672_v32  ;;  %v531_v11 = vpop.f32.mrb[6].mxu1  ;;  %v604_v12 = vpop.f32.mrb[22].mxu0  ;;  %972 = vmatprep.mubr.bf16.mxu1 %v662_v62  ;;  %1037 = vmatprep.mubr.bf16.mxu0 %v664_v1 }
 0x1ee   :  { %v532_v13 = vadd.f32 %v531_v11, %v2664_v29  ;;  %v605_v15 = vadd.f32 %v604_v12, %v2666_v30  ;;  %v533_v16 = vpop.f32.mrb[7].mxu1  ;;  %v606_v17 = vpop.f32.mrb[23].mxu0  ;;  %973 = vmatmul.mubr.bf16.vlgmr.msra.gmra.mrb[16].mxu1 %v661_v55  ;;  %1038 = vmatmul.mubr.bf16.vlgmr.msra.gmra.mrb[32].mxu0 %v663_v58  ;;  %v637_v18 = vmax.f32 %v528_v4, 0.0  ;;  %v639_v19 = vmax.f32 %v601_v5, 0.0 }
 0x1ef   :  { %v534_v60 = vadd.f32 %v533_v16, %v2670_v31  ;;  %v607_v61 = vadd.f32 %v606_v17, %v2672_v32  ;;  %2178 = vmatpush3.bf16.msra.mxu1 %v2385_v25  ;;  %v638_v23 = vmax.f32 %v530_v9, 0.0  ;;  %v640_v24 = vmax.f32 %v603_v10, 0.0 }
 0x1f0   :  { %v641_v20 = vmax.f32 %v532_v13, 0.0  ;;  %v643_v21 = vmax.f32 %v605_v15, 0.0  ;;  %2179 = vmatprep.subr.bf16.mxu1 %v2386_v8 }
 0x1f1   :  { %v642_v26 = vmax.f32 %v534_v60, 0.0  ;;  %v644_v27 = vmax.f32 %v607_v61, 0.0 }
 0x1f2   :  { %v665_v28 = vpack.c.bf16 %v641_v20, %v637_v18  ;;  %v667_v33 = vpack.c.bf16 %v643_v21, %v639_v19 }
 0x1f3   :  { %v666_v34 = vpack.c.bf16 %v642_v26, %v638_v23  ;;  %v668_v35 = vpack.c.bf16 %v644_v27, %v640_v24  ;;  %v537_v37 = vpop.f32.mrb[8].mxu1  ;;  %v610_v38 = vpop.f32.mrb[24].mxu0  ;;  %2180 = vmatpush3.bf16.msra.mxu1 %v2386_v8 }
 0x1f4   :  { %v538_v39 = vadd.f32 %v537_v37, %v2664_v29  ;;  %v611_v25 = vadd.f32 %v610_v38, %v2666_v30  ;;  %v539_v40 = vpop.f32.mrb[9].mxu1  ;;  %v612_v57 = vpop.f32.mrb[25].mxu0  ;;  %2181 = vmatprep.subr.bf16.mxu1 %v2387_v22  ;;  %v2392_v37 = vld [vmem:[#allocation2 + $0x248] ss:$40 sps:$4 sm:$0xff]   ;;  %v2393_v38 = vld [vmem:[#allocation2 + $0x1c] ss:$40 sps:$4 sm:$0xff]  }
 0x1f5   :  { %v540_v42 = vadd.f32 %v539_v40, %v2670_v31  ;;  %v613_v56 = vadd.f32 %v612_v57, %v2672_v32  ;;  %v541_v59 = vpop.f32.mrb[10].mxu1  ;;  %v614_v43 = vpop.f32.mrb[26].mxu0  ;;  %980 = vmatprep.mubr.bf16.mxu1 %v666_v34  ;;  %1045 = vmatprep.mubr.bf16.mxu0 %v668_v35  ;;  %v2389_v35 = vld [vmem:[#allocation2 + $0x158] ss:$40 sps:$4 sm:$0xff]   ;;  %v2396_v40 = vld [vmem:[#allocation2 + $0x10c] ss:$40 sps:$4 sm:$0xff]  }
 0x1f6   :  { %v542_v44 = vadd.f32 %v541_v59, %v2664_v29  ;;  %v615_v45 = vadd.f32 %v614_v43, %v2666_v30  ;;  %v543_v46 = vpop.f32.mrb[11].mxu1  ;;  %v616_v47 = vpop.f32.mrb[27].mxu0  ;;  %981 = vmatmul.mubr.bf16.gmra.mrb[20].mxu1 %v665_v28  ;;  %1046 = vmatmul.mubr.bf16.gmra.mrb[36].mxu0 %v667_v33  ;;  %v645_v50 = vmax.f32 %v538_v39, 0.0  ;;  %v647_v51 = vmax.f32 %v611_v25, 0.0  ;;  %v2394_v39 = vld [vmem:[#allocation2 + $0x6c] ss:$40 sps:$4 sm:$0xff]  }
 0x1f7   :  { %v544_v48 = vadd.f32 %v543_v46, %v2670_v31  ;;  %v617_v49 = vadd.f32 %v616_v47, %v2672_v32  ;;  %2182 = vmatpush3.bf16.msra.mxu1 %v2387_v22  ;;  %v646_v54 = vmax.f32 %v540_v42, 0.0  ;;  %v648_v55 = vmax.f32 %v613_v56, 0.0  ;;  %2201 = vmatprep.subr.bf16.mxu0 %v2393_v38  ;;  %v2395_v25 = vld [vmem:[#allocation2 + $0xbc] ss:$40 sps:$4 sm:$0xff]  }
 0x1f8   :  { %v649_v52 = vmax.f32 %v542_v44, 0.0  ;;  %v651_v53 = vmax.f32 %v615_v45, 0.0  ;;  %2183 = vmatprep.subr.bf16.mxu1 %v2388_v41  ;;  %2202 = vmatpush3.bf16.msra.mxu0 %v2393_v38  ;;  %v2397_v57 = vld [vmem:[#allocation2 + $0x15c] ss:$40 sps:$4 sm:$0xff]  }
 0x1f9   :  { %v650_v58 = vmax.f32 %v544_v48, 0.0  ;;  %v652_v62 = vmax.f32 %v617_v49, 0.0  ;;  %2203 = vmatprep.subr.bf16.mxu0 %v2394_v39  ;;  %v2709_v59 = vld [vmem:[%s2813_s3 + $0x6] ss:$0 sm:$0xff] }
 0x1fa   :  { %v669_v1 = vpack.c.bf16 %v649_v52, %v645_v50  ;;  %v671_v2 = vpack.c.bf16 %v651_v53, %v647_v51 }
 0x1fb   :  { %v670_v3 = vpack.c.bf16 %v650_v58, %v646_v54  ;;  %v672_v4 = vpack.c.bf16 %v652_v62, %v648_v55  ;;  %v547_v5 = vpop.f32.mrb[12].mxu1  ;;  %v620_v6 = vpop.f32.mrb[28].mxu0  ;;  %2184 = vmatpush3.bf16.msra.mxu1 %v2388_v41  ;;  %v2398_v41 = vld [vmem:[#allocation2 + $0x1ac] ss:$40 sps:$4 sm:$0xff]  }
 0x1fc   :  { %v548_v7 = vadd.f32 %v547_v5, %v2664_v29  ;;  %v621_v8 = vadd.f32 %v620_v6, %v2666_v30  ;;  %v549_v9 = vpop.f32.mrb[13].mxu1  ;;  %v622_v10 = vpop.f32.mrb[29].mxu0  ;;  %2185 = vmatprep.subr.bf16.mxu1 %v2389_v35  ;;  %2204 = vmatpush3.bf16.msra.mxu0 %v2394_v39 }
 0x1fd   :  { %v550_v11 = vadd.f32 %v549_v9, %v2670_v31  ;;  %v623_v12 = vadd.f32 %v622_v10, %v2672_v32  ;;  %v551_v13 = vpop.f32.mrb[14].mxu1  ;;  %v624_v15 = vpop.f32.mrb[30].mxu0  ;;  %988 = vmatprep.mubr.bf16.mxu1 %v670_v3  ;;  %1053 = vmatprep.mubr.bf16.mxu0 %v672_v4 }
 0x1fe   :  { %v552_v16 = vadd.f32 %v551_v13, %v2664_v29  ;;  %v625_v17 = vadd.f32 %v624_v15, %v2666_v30  ;;  %v553_v60 = vpop.f32.mrb[15].mxu1  ;;  %v626_v61 = vpop.f32.mrb[31].mxu0  ;;  %989 = vmatmul.mubr.bf16.gmra.mrb[24].mxu1 %v669_v1  ;;  %1054 = vmatmul.mubr.bf16.gmra.mrb[40].mxu0 %v671_v2  ;;  %v653_v20 = vmax.f32 %v548_v7, 0.0  ;;  %v655_v21 = vmax.f32 %v621_v8, 0.0 }
 0x1ff   :  { %v554_v18 = vadd.f32 %v553_v60, %v2670_v31  ;;  %v627_v19 = vadd.f32 %v626_v61, %v2672_v32  ;;  %v654_v24 = vmax.f32 %v550_v11, 0.0  ;;  %v656_v26 = vmax.f32 %v623_v12, 0.0  ;;  %2186 = vmatpush3.bf16.msra.mxu1 %v2389_v35  ;;  %v2390_v31 = vld [vmem:[#allocation2 + $0x1a8] ss:$40 sps:$4 sm:$0xff]   ;;  %v2391_v32 = vld [vmem:[#allocation2 + $0x1f8] ss:$40 sps:$4 sm:$0xff]   ;;  %2205 = vmatprep.subr.bf16.mxu0 %v2395_v25 }
 0x200   :  { %v657_v22 = vmax.f32 %v552_v16, 0.0  ;;  %v659_v23 = vmax.f32 %v625_v17, 0.0  ;;  %2187 = vmatprep.subr.bf16.mxu1 %v2390_v31  ;;  %2206 = vmatpush3.bf16.msra.mxu0 %v2395_v25 }
 0x201   :  { %v658_v27 = vmax.f32 %v554_v18, 0.0  ;;  %v660_v28 = vmax.f32 %v627_v19, 0.0  ;;  %2207 = vmatprep.subr.bf16.mxu0 %v2396_v40 }
 0x202   :  { %v673_v33 = vpack.c.bf16 %v657_v22, %v653_v20  ;;  %v675_v29 = vpack.c.bf16 %v659_v23, %v655_v21 }
 0x203   :  { %v674_v34 = vpack.c.bf16 %v658_v27, %v654_v24  ;;  %v676_v30 = vpack.c.bf16 %v660_v28, %v656_v26  ;;  %2188 = vmatpush3.bf16.msra.mxu1 %v2390_v31 }
 0x204   :  { %2189 = vmatprep.subr.bf16.mxu1 %v2391_v32  ;;  %2208 = vmatpush3.bf16.msra.mxu0 %v2396_v40 }
 0x205   :  { %996 = vmatprep.mubr.bf16.mxu1 %v674_v34  ;;  %1061 = vmatprep.mubr.bf16.mxu0 %v676_v30 }
 0x206   :  { %997 = vmatmul.mubr.bf16.gmra.mrb[28].mxu1 %v673_v33  ;;  %1062 = vmatmul.mubr.bf16.gmra.mrb[44].mxu0 %v675_v29 }
 0x207   :  { %2190 = vmatpush3.bf16.msra.mxu1 %v2391_v32  ;;  %2209 = vmatprep.subr.bf16.mxu0 %v2397_v57 }
 0x208   :  { %2191 = vmatprep.subr.bf16.mxu1 %v2392_v37  ;;  %2210 = vmatpush3.bf16.msra.mxu0 %v2397_v57 }
 0x209   :  { %2211 = vmatprep.subr.bf16.mxu0 %v2398_v41 }
 0x20b   :  { %2192 = vmatpush3.bf16.msra.mxu1 %v2392_v37 }
 0x20c   :  { %2212 = vmatpush3.bf16.msra.mxu0 %v2398_v41 }
 0x2c1   :  { %v2025_v42 = vpop.f32.mrb[16].mxu1  ;;  %v2065_v56 = vpop.f32.mrb[32].mxu0 }
 0x2c2   :  { %v2026_v43 = vpop.f32.mrb[17].mxu1  ;;  %v2066_v44 = vpop.f32.mrb[33].mxu0 }
 0x2c3   :  { %v2027_v45 = vadd.f32 %v2026_v43, %v2025_v42  ;;  %v2067_v46 = vadd.f32 %v2066_v44, %v2065_v56  ;;  %v2028_v47 = vpop.f32.mrb[18].mxu1  ;;  %v2068_v48 = vpop.f32.mrb[34].mxu0 }
 0x2c4   :  { %v2029_v49 = vpop.f32.mrb[19].mxu1  ;;  %v2069_v50 = vpop.f32.mrb[35].mxu0 }
 0x2c5   :  { %v975_v51 = vadd.f32 %v2027_v45, %v2709_v59  ;;  %v2030_v52 = vadd.f32 %v2029_v49, %v2028_v47  ;;  %v2070_v53 = vadd.f32 %v2069_v50, %v2068_v48  ;;  %v2399_v50 = vld [vmem:[#allocation2 + $0x1fc] ss:$40 sps:$4 sm:$0xff]  }
 0x2c6   :  { %2213 = vmatprep.subr.bf16.mxu0 %v2399_v50 }
 0x2c7   :  { %v1040_v54 = vadd.f32 %v2067_v46, %v975_v51  ;;  %v978_v55 = vadd.f32 %v2030_v52, %v2709_v59  ;;  %2214 = vmatpush3.bf16.msra.mxu0 %v2399_v50  ;;  %v2400_v51 = vld [vmem:[#allocation2 + $0x24c] ss:$40 sps:$4 sm:$0xff]   ;;  %v2401_v52 = vld [vmem:[%s2812_s2 + $0x140] sm:$0xff]  }
 0x2c8   :  { %2215 = vmatprep.subr.bf16.mxu0 %v2400_v51  ;;  %2113 = vmatprep.subr.bf16.mxu1 %v2401_v52 }
 0x2c9   :  { %v1043_v58 = vadd.f32 %v2070_v53, %v978_v55  ;;  %v2031_v62 = vpop.f32.mrb[20].mxu1  ;;  %v2071_v1 = vpop.f32.mrb[36].mxu0  ;;  %v2402_v53 = vld [vmem:[%s2812_s2 + $0x100] sm:$0xff]   ;;  %v2406_v55 = vld [vmem:[%s2812_s2 + $0x110] sm:$0xff]  }
 0x2ca   :  { %v2032_v2 = vpop.f32.mrb[21].mxu1  ;;  %v2072_v3 = vpop.f32.mrb[37].mxu0 }
 0x2cb   :  { %v2033_v4 = vadd.f32 %v2032_v2, %v2031_v62  ;;  %v2073_v5 = vadd.f32 %v2072_v3, %v2071_v1  ;;  %v2034_v6 = vpop.f32.mrb[22].mxu1  ;;  %v2074_v7 = vpop.f32.mrb[38].mxu0  ;;  %v1070_v8 = vpack.c.bf16 %v1043_v58, %v1040_v54  ;;  %2216 = vmatpush3.bf16.msra.mxu0 %v2400_v51  ;;  %v2405_v54 = vld [vmem:[%s2812_s2 + $0x150] sm:$0xff]   ;;  %v2407_v58 = vld [vmem:[%s2812_s2 + $0x158] sm:$0xff]   ;;  %v2409_v1 = vld [vmem:[%s2812_s2 + $0x160] sm:$0xff]  }
 0x2cc   :  { %v2035_v9 = vpop.f32.mrb[23].mxu1  ;;  %v2075_v10 = vpop.f32.mrb[39].mxu0  ;;  %v2408_v62 = vld [vmem:[%s2812_s2 + $0x118] sm:$0xff]   ;;  %v2410_v2 = vld [vmem:[%s2812_s2 + $0x120] sm:$0xff]   ;;  %v2411_v3 = vld [vmem:[%s2812_s2 + $0x168] sm:$0xff]  }
 0x2cd   :  { %v983_v11 = vadd.f32 %v2033_v4, %v2709_v59  ;;  %v2036_v12 = vadd.f32 %v2035_v9, %v2034_v6  ;;  %v2076_v13 = vadd.f32 %v2075_v10, %v2074_v7  ;;  %2193 = vmatprep.mubr.bf16.mxu1 %v1070_v8  ;;  %v2412_v4 = vld [vmem:[%s2812_s2 + $0x128] sm:$0xff]  }
 0x2cf   :  { %v1048_v15 = vadd.f32 %v2073_v5, %v983_v11  ;;  %v986_v16 = vadd.f32 %v2036_v12, %v2709_v59  ;;  %v1956_v5 = vld [vmem:[%s2813_s3 + $0x7] ss:$0 sm:$0xff] }
 0x2d1   :  { %v1051_v17 = vadd.f32 %v2076_v13, %v986_v16  ;;  %v2037_v60 = vpop.f32.mrb[24].mxu1  ;;  %v2077_v61 = vpop.f32.mrb[40].mxu0 }
 0x2d2   :  { %v2038_v18 = vpop.f32.mrb[25].mxu1  ;;  %v2078_v19 = vpop.f32.mrb[41].mxu0 }
 0x2d3   :  { %v1071_v20 = vpack.c.bf16 %v1051_v17, %v1048_v15  ;;  %v2039_v21 = vadd.f32 %v2038_v18, %v2037_v60  ;;  %v2079_v22 = vadd.f32 %v2078_v19, %v2077_v61  ;;  %v2040_v23 = vpop.f32.mrb[26].mxu1  ;;  %v2080_v24 = vpop.f32.mrb[42].mxu0 }
 0x2d4   :  { %v2041_v26 = vpop.f32.mrb[27].mxu1  ;;  %v2081_v27 = vpop.f32.mrb[43].mxu0 }
 0x2d5   :  { %v991_v28 = vadd.f32 %v2039_v21, %v2709_v59  ;;  %v2042_v33 = vadd.f32 %v2041_v26, %v2040_v23  ;;  %v2082_v29 = vadd.f32 %v2081_v27, %v2080_v24  ;;  %2194 = vmatmul.mubr.bf16.vlgmr.msra.gmra.mrb[32].mxu1 %v1071_v20 }
 0x2d6   :  { %2114 = vmatpush3.bf16.msra.mxu1 %v2402_v53 }
 0x2d7   :  { %v1056_v34 = vadd.f32 %v2079_v22, %v991_v28  ;;  %v994_v30 = vadd.f32 %v2042_v33, %v2709_v59 }
 0x2d9   :  { %v1059_v35 = vadd.f32 %v2082_v29, %v994_v30  ;;  %v2043_v31 = vpop.f32.mrb[28].mxu1  ;;  %v2083_v32 = vpop.f32.mrb[44].mxu0 }
 0x2da   :  { %v2044_v37 = vpop.f32.mrb[29].mxu1  ;;  %v2084_v38 = vpop.f32.mrb[45].mxu0 }
 0x2db   :  { %v2045_v39 = vadd.f32 %v2044_v37, %v2043_v31  ;;  %v2085_v25 = vadd.f32 %v2084_v38, %v2083_v32  ;;  %v2046_v40 = vpop.f32.mrb[30].mxu1  ;;  %v2086_v57 = vpop.f32.mrb[46].mxu0  ;;  %v1072_v41 = vpack.c.bf16 %v1059_v35, %v1056_v34  ;;  %v2413_v31 = vld [vmem:[%s2812_s2 + $0x170] sm:$0xff]   ;;  %v2415_v37 = vld [vmem:[%s2812_s2 + $0x178] sm:$0xff]  }
 0x2dc   :  { %v2047_v42 = vpop.f32.mrb[31].mxu1  ;;  %v2087_v56 = vpop.f32.mrb[47].mxu0  ;;  %v2414_v32 = vld [vmem:[%s2812_s2 + $0x130] sm:$0xff]   ;;  %v2416_v38 = vld [vmem:[%s2812_s2 + $0x138] sm:$0xff]  }
 0x2dd   :  { %v999_v43 = vadd.f32 %v2045_v39, %v2709_v59  ;;  %v2048_v44 = vadd.f32 %v2047_v42, %v2046_v40  ;;  %v2088_v45 = vadd.f32 %v2087_v56, %v2086_v57  ;;  %2197 = vmatprep.mubr.bf16.mxu1 %v1072_v41  ;;  %v2417_v39 = vld [vmem:[#allocation2 + $0x20] ss:$40 sps:$4 sm:$0xff]  }
 0x2de   :  { %2225 = vmatprep.subr.bf16.mxu0 %v2417_v39  ;;  %v2419_v40 = vld [vmem:[#allocation2 + $0xc0] ss:$40 sps:$4 sm:$0xff]  }
 0x2df   :  { %v1064_v46 = vadd.f32 %v2085_v25, %v999_v43  ;;  %v1002_v47 = vadd.f32 %v2048_v44, %v2709_v59  ;;  %v2403_v59 = vld [vmem:[%s2812_s2 + $0x148] sm:$0xff]   ;;  %v2418_v25 = vld [vmem:[#allocation2 + $0x70] ss:$40 sps:$4 sm:$0xff]  }
 0x2e0   :  { %2115 = vmatprep.subr.bf16.mxu1 %v2403_v59  ;;  %v1965_v41 = vld [vmem:[%s2813_s3 + $0x8] ss:$0 sm:$0xff] }
 0x2e1   :  { %v1067_v48 = vadd.f32 %v2088_v45, %v1002_v47 }
 0x2e3   :  { %v1073_v49 = vpack.c.bf16 %v1067_v48, %v1064_v46 }
 0x2e5   :  { %2198 = vmatmul.mubr.bf16.gmra.mrb[36].mxu1 %v1073_v49 }
 0x2e6   :  { %1529 = vmatprep.mubr.bf16.mxu1 %v2547_v14  ;;  %v2404_v14 = vld [vmem:[%s2812_s2 + $0x108] sm:$0xff]  }
 0x2e7   :  { %2116 = vmatpush3.bf16.msra.mxu1 %v2404_v14 }
 0x2e8   :  { %2117 = vmatprep.subr.bf16.mxu1 %v2405_v54 }
 0x2eb   :  { %2118 = vmatpush3.bf16.msra.mxu1 %v2406_v55 }
 0x2ec   :  { %2119 = vmatprep.subr.bf16.mxu1 %v2407_v58 }
 0x2ef   :  { %2120 = vmatpush3.bf16.msra.mxu1 %v2408_v62 }
 0x2f0   :  { %2121 = vmatprep.subr.bf16.mxu1 %v2409_v1  ;;  %v2420_v1 = vld [vmem:[#allocation2 + $0x110] ss:$40 sps:$4 sm:$0xff]  }
 0x2f3   :  { %2122 = vmatpush3.bf16.msra.mxu1 %v2410_v2  ;;  %v2422_v2 = vld [vmem:[#allocation2 + $0x1b0] ss:$40 sps:$4 sm:$0xff]  }
 0x2f4   :  { %2123 = vmatprep.subr.bf16.mxu1 %v2411_v3  ;;  %v2424_v3 = vld [vmem:[#allocation2 + $0x250] ss:$40 sps:$4 sm:$0xff]  }
 0x2f7   :  { %2124 = vmatpush3.bf16.msra.mxu1 %v2412_v4  ;;  %v2425_v4 = vld [vmem:[#allocation2 + $0x24] ss:$40 sps:$4 sm:$0xff]  }
 0x2f8   :  { %2125 = vmatprep.subr.bf16.mxu1 %v2413_v31 }
 0x2fb   :  { %2126 = vmatpush3.bf16.msra.mxu1 %v2414_v32 }
 0x2fc   :  { %2127 = vmatprep.subr.bf16.mxu1 %v2415_v37 }
 0x2ff   :  { %2128 = vmatpush3.bf16.msra.mxu1 %v2416_v38 }
 0x300   :  { %2249 = vmatprep.subr.bf16.mxu1 %v2425_v4 }
 0x3a8   :  { %v2195_v6 = vpop.f32.mrb[32].mxu1 }
 0x3a9   :  { %v1188_v7 = vadd.f32 %v2195_v6, %v1956_v5  ;;  %v1179_v8 = vpop.f32.mrb[33].mxu1  ;;  %v2428_v6 = vld [vmem:[#allocation2 + $0x114] ss:$40 sps:$4 sm:$0xff]  }
 0x3aa   :  { %v1180_v9 = vadd.f32 %v1956_v5, %v1179_v8  ;;  %v2196_v10 = vpop.f32.mrb[34].mxu1  ;;  %v2430_v8 = vld [vmem:[#allocation2 + $0x1b4] ss:$40 sps:$4 sm:$0xff]  }
 0x3ab   :  { %v1191_v11 = vadd.f32 %v2196_v10, %v1956_v5  ;;  %v1182_v12 = vpop.f32.mrb[35].mxu1  ;;  %v1212_v15 = vmax.f32 %v1188_v7, 0.0  ;;  %v2429_v7 = vld [vmem:[#allocation2 + $0x164] ss:$40 sps:$4 sm:$0xff]   ;;  %v1974_v10 = vld [vmem:[%s2813_s3 + $0x9] ss:$0 sm:$0xff] }
 0x3ac   :  { %v1183_v13 = vadd.f32 %v1956_v5, %v1182_v12  ;;  %v1210_v17 = vmax.f32 %v1180_v9, 0.0 }
 0x3ad   :  { %v1213_v16 = vmax.f32 %v1191_v11, 0.0 }
 0x3ae   :  { %v1211_v60 = vmax.f32 %v1183_v13, 0.0 }
 0x3af   :  { %v1219_v61 = vpack.c.bf16 %v1213_v16, %v1212_v15 }
 0x3b0   :  { %v1218_v18 = vpack.c.bf16 %v1211_v60, %v1210_v17 }
 0x3b2   :  { %2217 = vmatprep.mubr.bf16.mxu0 %v1218_v18 }
 0x3b3   :  { %2218 = vmatmul.mubr.bf16.vlgmr.msra.gmra.mrb[48].mxu0 %v1219_v61 }
 0x3b4   :  { %2226 = vmatpush3.bf16.msra.mxu0 %v2417_v39 }
 0x3b5   :  { %2227 = vmatprep.subr.bf16.mxu0 %v2418_v25 }
 0x3b8   :  { %v2199_v19 = vpop.f32.mrb[36].mxu1  ;;  %2228 = vmatpush3.bf16.msra.mxu0 %v2418_v25 }
 0x3b9   :  { %v1204_v20 = vadd.f32 %v2199_v19, %v1956_v5  ;;  %v1195_v21 = vpop.f32.mrb[37].mxu1  ;;  %2229 = vmatprep.subr.bf16.mxu0 %v2419_v40 }
 0x3ba   :  { %v1196_v22 = vadd.f32 %v1956_v5, %v1195_v21  ;;  %v2200_v23 = vpop.f32.mrb[38].mxu1 }
 0x3bb   :  { %v1207_v24 = vadd.f32 %v2200_v23, %v1956_v5  ;;  %v1198_v26 = vpop.f32.mrb[39].mxu1  ;;  %v1216_v28 = vmax.f32 %v1204_v20, 0.0 }
 0x3bc   :  { %v1199_v27 = vadd.f32 %v1956_v5, %v1198_v26  ;;  %v1214_v29 = vmax.f32 %v1196_v22, 0.0  ;;  %2230 = vmatpush3.bf16.msra.mxu0 %v2419_v40  ;;  %v2426_v5 = vld [vmem:[#allocation2 + $0x74] ss:$40 sps:$4 sm:$0xff]  }
 0x3bd   :  { %v1217_v33 = vmax.f32 %v1207_v24, 0.0  ;;  %2231 = vmatprep.subr.bf16.mxu0 %v2420_v1 }
 0x3be   :  { %v1215_v34 = vmax.f32 %v1199_v27, 0.0 }
 0x3bf   :  { %v1221_v30 = vpack.c.bf16 %v1217_v33, %v1216_v28 }
 0x3c0   :  { %v1220_v35 = vpack.c.bf16 %v1215_v34, %v1214_v29  ;;  %2232 = vmatpush3.bf16.msra.mxu0 %v2420_v1 }
 0x3c2   :  { %2221 = vmatprep.mubr.bf16.mxu0 %v1220_v35 }
 0x3c3   :  { %2222 = vmatmul.mubr.bf16.gmra.mrb[52].mxu0 %v1221_v30 }
 0x486   :  { %v2219_v57 = vpop.f32.mrb[48].mxu0 }
 0x487   :  { %v1327_v42 = vpop.f32.mrb[49].mxu0  ;;  %v1336_v43 = vadd.f32 %v2219_v57, %v1965_v41 }
 0x488   :  { %v2220_v56 = vpop.f32.mrb[50].mxu0  ;;  %v1328_v46 = vadd.f32 %v1965_v41, %v1327_v42 }
 0x489   :  { %v1339_v44 = vadd.f32 %v2220_v56, %v1965_v41  ;;  %v1330_v45 = vpop.f32.mrb[51].mxu0 }
 0x48a   :  { %v1331_v47 = vadd.f32 %v1965_v41, %v1330_v45 }
 0x48b   :  { %v1359_v48 = vpack.c.bf16 %v1339_v44, %v1336_v43 }
 0x48c   :  { %v1358_v49 = vpack.c.bf16 %v1331_v47, %v1328_v46 }
 0x48e   :  { %1530 = vmatmul.mubr.bf16.vlgmr.msra.gmra.mrb[40].mxu1 %v1358_v49 }
 0x48f   :  { %1537 = vmatprep.mubr.bf16.mxu1 %v2579_v36  ;;  %v2421_v36 = vld [vmem:[#allocation2 + $0x160] ss:$40 sps:$4 sm:$0xff]   ;;  %2250 = vmatpush3.bf16.msra.mxu1 %v2425_v4 }
 0x490   :  { %2233 = vmatprep.subr.bf16.mxu0 %v2421_v36  ;;  %2251 = vmatprep.subr.bf16.mxu1 %v2426_v5 }
 0x491   :  { %2234 = vmatpush3.bf16.msra.mxu0 %v2421_v36 }
 0x492   :  { %2235 = vmatprep.subr.bf16.mxu0 %v2422_v2 }
 0x493   :  { %2252 = vmatpush3.bf16.msra.mxu1 %v2426_v5 }
 0x495   :  { %2236 = vmatpush3.bf16.msra.mxu0 %v2422_v2 }
 0x496   :  { %v2223_v50 = vpop.f32.mrb[52].mxu0  ;;  %1538 = vmatmul.mubr.bf16.gmra.mrb[44].mxu1 %v1359_v48 }
 0x497   :  { %v1343_v51 = vpop.f32.mrb[53].mxu0  ;;  %1545 = vmatprep.mubr.bf16.mxu1 %v2611_v63  ;;  %v1352_v53 = vadd.f32 %v2223_v50, %v1965_v41  ;;  %v2423_v63 = vld [vmem:[#allocation2 + $0x200] ss:$40 sps:$4 sm:$0xff]  }
 0x498   :  { %v2224_v52 = vpop.f32.mrb[54].mxu0  ;;  %v1344_v54 = vadd.f32 %v1965_v41, %v1343_v51  ;;  %2237 = vmatprep.subr.bf16.mxu0 %v2423_v63 }
 0x499   :  { %v1355_v59 = vadd.f32 %v2224_v52, %v1965_v41  ;;  %v1346_v14 = vpop.f32.mrb[55].mxu0  ;;  %2238 = vmatpush3.bf16.msra.mxu0 %v2423_v63  ;;  %v2431_v52 = vld [vmem:[#allocation2 + $0x204] ss:$40 sps:$4 sm:$0xff]  }
 0x49a   :  { %v1347_v55 = vadd.f32 %v1965_v41, %v1346_v14  ;;  %2239 = vmatprep.subr.bf16.mxu0 %v2424_v3 }
 0x49b   :  { %v1361_v58 = vpack.c.bf16 %v1355_v59, %v1352_v53  ;;  %v2432_v53 = vld [vmem:[#allocation2 + $0x254] ss:$40 sps:$4 sm:$0xff]   ;;  %v1991_v59 = vld [vmem:[%s2813_s3 + $0xa] ss:$0 sm:$0xff] }
 0x49c   :  { %v1360_v62 = vpack.c.bf16 %v1347_v55, %v1344_v54 }
 0x49d   :  { %2240 = vmatpush3.bf16.msra.mxu0 %v2424_v3 }
 0x49e   :  { %1546 = vmatmul.mubr.bf16.gmra.mrb[48].mxu1 %v1360_v62 }
 0x49f   :  { %1553 = vmatprep.mubr.bf16.mxu1 %v2628_v0  ;;  %v2427_v0 = vld [vmem:[#allocation2 + $0xc4] ss:$40 sps:$4 sm:$0xff]  }
 0x4a0   :  { %2253 = vmatprep.subr.bf16.mxu1 %v2427_v0 }
 0x4a1   :  { %2254 = vmatpush3.bf16.msra.mxu1 %v2427_v0 }
 0x4a2   :  { %2255 = vmatprep.subr.bf16.mxu1 %v2428_v6 }
 0x4a5   :  { %2256 = vmatpush3.bf16.msra.mxu1 %v2428_v6 }
 0x4a6   :  { %1554 = vmatmul.mubr.bf16.gmra.mrb[52].mxu1 %v1361_v58  ;;  %2257 = vmatprep.subr.bf16.mxu1 %v2429_v7 }
 0x4a9   :  { %2258 = vmatpush3.bf16.msra.mxu1 %v2429_v7 }
 0x4aa   :  { %2259 = vmatprep.subr.bf16.mxu1 %v2430_v8 }
 0x4ad   :  { %2260 = vmatpush3.bf16.msra.mxu1 %v2430_v8 }
 0x4ae   :  { %2261 = vmatprep.subr.bf16.mxu1 %v2431_v52 }
 0x4b1   :  { %2262 = vmatpush3.bf16.msra.mxu1 %v2431_v52 }
 0x4b2   :  { %2263 = vmatprep.subr.bf16.mxu1 %v2432_v53 }
 0x4b5   :  { %2264 = vmatpush3.bf16.msra.mxu1 %v2432_v53 }
 0x561   :  { %v2129_v9 = vpop.f32.mrb[40].mxu1 }
 0x562   :  { %v2130_v11 = vpop.f32.mrb[41].mxu1 }
 0x563   :  { %v2131_v12 = vadd.f32 %v2130_v11, %v2129_v9  ;;  %v2132_v13 = vpop.f32.mrb[42].mxu1 }
 0x564   :  { %v2133_v15 = vpop.f32.mrb[43].mxu1 }
 0x565   :  { %v1532_v16 = vadd.f32 %v2131_v12, %v1974_v10  ;;  %v2134_v17 = vadd.f32 %v2133_v15, %v2132_v13 }
 0x567   :  { %v1535_v60 = vadd.f32 %v2134_v17, %v1974_v10  ;;  %v1562_v61 = vmax.f32 %v1532_v16, 0.0 }
 0x569   :  { %v1563_v18 = vmax.f32 %v1535_v60, 0.0  ;;  %v2135_v19 = vpop.f32.mrb[44].mxu1 }
 0x56a   :  { %v2136_v20 = vpop.f32.mrb[45].mxu1 }
 0x56b   :  { %v2137_v21 = vadd.f32 %v2136_v20, %v2135_v19  ;;  %v2138_v22 = vpop.f32.mrb[46].mxu1  ;;  %v1570_v23 = vpack.c.bf16 %v1563_v18, %v1562_v61  ;;  %v2000_v20 = vld [vmem:[%s2813_s3 + $0xb] ss:$0 sm:$0xff] }
 0x56c   :  { %v2139_v24 = vpop.f32.mrb[47].mxu1 }
 0x56d   :  { %v1540_v26 = vadd.f32 %v2137_v21, %v1974_v10  ;;  %v2140_v27 = vadd.f32 %v2139_v24, %v2138_v22  ;;  %2241 = vmatprep.mubr.bf16.mxu0 %v1570_v23 }
 0x56f   :  { %v1543_v28 = vadd.f32 %v2140_v27, %v1974_v10  ;;  %v1564_v33 = vmax.f32 %v1540_v26, 0.0 }
 0x571   :  { %v1565_v29 = vmax.f32 %v1543_v28, 0.0  ;;  %v2141_v34 = vpop.f32.mrb[48].mxu1 }
 0x572   :  { %v2142_v30 = vpop.f32.mrb[49].mxu1 }
 0x573   :  { %v1571_v35 = vpack.c.bf16 %v1565_v29, %v1564_v33  ;;  %v2143_v31 = vadd.f32 %v2142_v30, %v2141_v34  ;;  %v2144_v32 = vpop.f32.mrb[50].mxu1 }
 0x574   :  { %v2145_v37 = vpop.f32.mrb[51].mxu1 }
 0x575   :  { %v1548_v38 = vadd.f32 %v2143_v31, %v1974_v10  ;;  %v2146_v39 = vadd.f32 %v2145_v37, %v2144_v32  ;;  %2242 = vmatmul.mubr.bf16.vlgmr.msra.gmra.mrb[56].mxu0 %v1571_v35 }
 0x577   :  { %v1551_v25 = vadd.f32 %v2146_v39, %v1974_v10  ;;  %v1566_v40 = vmax.f32 %v1548_v38, 0.0 }
 0x579   :  { %v1567_v57 = vmax.f32 %v1551_v25, 0.0  ;;  %v2147_v41 = vpop.f32.mrb[52].mxu1 }
 0x57a   :  { %v2148_v42 = vpop.f32.mrb[53].mxu1 }
 0x57b   :  { %v2149_v56 = vadd.f32 %v2148_v42, %v2147_v41  ;;  %v2150_v43 = vpop.f32.mrb[54].mxu1  ;;  %v1572_v44 = vpack.c.bf16 %v1567_v57, %v1566_v40 }
 0x57c   :  { %v2151_v45 = vpop.f32.mrb[55].mxu1 }
 0x57d   :  { %v1556_v46 = vadd.f32 %v2149_v56, %v1974_v10  ;;  %v2152_v47 = vadd.f32 %v2151_v45, %v2150_v43  ;;  %2245 = vmatprep.mubr.bf16.mxu0 %v1572_v44 }
 0x57f   :  { %v1559_v48 = vadd.f32 %v2152_v47, %v1974_v10  ;;  %v1568_v49 = vmax.f32 %v1556_v46, 0.0 }
 0x581   :  { %v1569_v50 = vmax.f32 %v1559_v48, 0.0 }
 0x583   :  { %v1573_v51 = vpack.c.bf16 %v1569_v50, %v1568_v49 }
 0x585   :  { %2246 = vmatmul.mubr.bf16.gmra.mrb[60].mxu0 %v1573_v51 }
 0x648   :  { %v2243_v14 = vpop.f32.mrb[56].mxu0 }
 0x649   :  { %v1688_v54 = vadd.f32 %v2243_v14, %v1991_v59  ;;  %v1679_v55 = vpop.f32.mrb[57].mxu0 }
 0x64a   :  { %v1680_v58 = vadd.f32 %v1991_v59, %v1679_v55  ;;  %v2244_v62 = vpop.f32.mrb[58].mxu0 }
 0x64b   :  { %v1691_v1 = vadd.f32 %v2244_v62, %v1991_v59  ;;  %v1682_v36 = vpop.f32.mrb[59].mxu0  ;;  %v1712_v63 = vmax.f32 %v1688_v54, 0.0 }
 0x64c   :  { %v1683_v2 = vadd.f32 %v1991_v59, %v1682_v36  ;;  %v1710_v4 = vmax.f32 %v1680_v58, 0.0 }
 0x64d   :  { %v1713_v3 = vmax.f32 %v1691_v1, 0.0 }
 0x64e   :  { %v1711_v5 = vmax.f32 %v1683_v2, 0.0 }
 0x64f   :  { %v1719_v0 = vpack.c.bf16 %v1713_v3, %v1712_v63 }
 0x650   :  { %v1718_v6 = vpack.c.bf16 %v1711_v5, %v1710_v4 }
 0x652   :  { %2265 = vmatprep.mubr.bf16.mxu1 %v1718_v6 }
 0x653   :  { %2266 = vmatmul.mubr.bf16.vlgmr.msra.gmra.mrb[56].mxu1 %v1719_v0 }
 0x658   :  { %v2247_v7 = vpop.f32.mrb[60].mxu0 }
 0x659   :  { %v1704_v8 = vadd.f32 %v2247_v7, %v1991_v59  ;;  %v1695_v9 = vpop.f32.mrb[61].mxu0 }
 0x65a   :  { %v1696_v10 = vadd.f32 %v1991_v59, %v1695_v9  ;;  %v2248_v11 = vpop.f32.mrb[62].mxu0 }
 0x65b   :  { %v1707_v12 = vadd.f32 %v2248_v11, %v1991_v59  ;;  %v1698_v13 = vpop.f32.mrb[63].mxu0  ;;  %v1716_v16 = vmax.f32 %v1704_v8, 0.0 }
 0x65c   :  { %v1699_v15 = vadd.f32 %v1991_v59, %v1698_v13  ;;  %v1714_v60 = vmax.f32 %v1696_v10, 0.0 }
 0x65d   :  { %v1717_v17 = vmax.f32 %v1707_v12, 0.0 }
 0x65e   :  { %v1715_v61 = vmax.f32 %v1699_v15, 0.0 }
 0x65f   :  { %v1721_v18 = vpack.c.bf16 %v1717_v17, %v1716_v16 }
 0x660   :  { %v1720_v19 = vpack.c.bf16 %v1715_v61, %v1714_v60 }
 0x662   :  { %2269 = vmatprep.mubr.bf16.mxu1 %v1720_v19 }
 0x663   :  { %2270 = vmatmul.mubr.bf16.gmra.mrb[60].mxu1 %v1721_v18 }
 0x726   :  { %v2267_v21 = vpop.f32.mrb[56].mxu1 }
 0x727   :  { %v1836_v22 = vadd.f32 %v2267_v21, %v2000_v20  ;;  %v1827_v23 = vpop.f32.mrb[57].mxu1 }
 0x728   :  { %v1828_v24 = vadd.f32 %v2000_v20, %v1827_v23  ;;  %v2268_v26 = vpop.f32.mrb[58].mxu1 }
 0x729   :  { %1860 = vst [vmem:[%s2814_s4 + $0x10] sm:$0xff] %v1836_v22  ;;  %v1839_v27 = vadd.f32 %v2268_v26, %v2000_v20  ;;  %v1830_v28 = vpop.f32.mrb[59].mxu1 }
 0x72a   :  { %1858 = vst [vmem:[%s2814_s4] sm:$0xff] %v1828_v24  ;;  %v1831_v33 = vadd.f32 %v2000_v20, %v1830_v28 }
 0x72b   :  { %1861 = vst [vmem:[%s2814_s4 + $0x18] sm:$0xff] %v1839_v27 }
 0x72c   :  { %1859 = vst [vmem:[%s2814_s4 + $0x8] sm:$0xff] %v1831_v33 }
 0x736   :  { %v2271_v29 = vpop.f32.mrb[60].mxu1 }
 0x737   :  { %v1852_v34 = vadd.f32 %v2271_v29, %v2000_v20  ;;  %v1843_v30 = vpop.f32.mrb[61].mxu1 }
 0x738   :  { %v1844_v35 = vadd.f32 %v2000_v20, %v1843_v30  ;;  %v2272_v31 = vpop.f32.mrb[62].mxu1 }
 0x739   :  { %1864 = vst [vmem:[%s2814_s4 + $0x30] sm:$0xff] %v1852_v34  ;;  %v1855_v32 = vadd.f32 %v2272_v31, %v2000_v20  ;;  %v1846_v37 = vpop.f32.mrb[63].mxu1 }
 0x73a   :  { %1862 = vst [vmem:[%s2814_s4 + $0x20] sm:$0xff] %v1844_v35  ;;  %v1847_v38 = vadd.f32 %v2000_v20, %v1846_v37 }
 0x73b   :  { %1865 = vst [vmem:[%s2814_s4 + $0x38] sm:$0xff] %v1855_v32 }
 0x73c   :  { %1863 = vst [vmem:[%s2814_s4 + $0x28] sm:$0xff] %v1847_v38 }
 0x73d   :  { %1870 = vsyncpa [#allocation3], 1 }

</bundles_post_ra>
